<compile_context>
chip_gen: v5e
topology: v5e:2x2
jax: 0.10.0
libtpu: 0.0.40
codegen_flags: <defaults>
</compile_context>

<pallas_src>
import jax
import jax.numpy as jnp
import numpy as np
from jax.experimental import pallas as pl
from jax.experimental.pallas import tpu as pltpu

LEAKY_SLOPE = 0.2
BN_EPS = 1e-5


# --------------------------------------------------------------------------- #
# Kernel                                                                       #
# --------------------------------------------------------------------------- #
def _resblock_kernel(lhs1_ref, a1_ref, a2_ref, s_ref, g_ref, gt_ref,
                     gamma1_ref, beta1_ref, gamma2_ref, beta2_ref,
                     x_ref, o_ref):
    """Whole ResBlock in one invocation (everything resident in VMEM).

    lhs1_ref : (N*H, 3*(W+2)*C) bf16   conv1 LHS (3 H-shifted, W-padded row slabs)
    a1_ref   : (3*(W+2)*C, W*C) bf16   conv1 block-banded weights
    a2_ref   : (3, W*C, W*C)    bf16   conv2 banded weights (W zero-pad folded in)
    s_ref    : (3, N*H, N*H)    f32    0/1 row-shift matrices (H zero-pad)
    g_ref    : (W*C, C)         f32    per-channel gather (lane -> channel)
    gt_ref   : (C, W*C)         f32    per-channel broadcast (channel -> lane)
    gamma/beta : (1, C)         f32    BN affine parameters
    x_ref    : (N*H, W*C)       f32    identity path (lane-dense, unpadded)
    o_ref    : (N*H, W*C)       f32    output (lane-dense)
    """
    NH, WC = o_ref.shape
    C = gamma1_ref.shape[-1]
    W = WC // C
    inv_count = 1.0 / float(NH * W)          # 1 / (N*H*W)

    def batchnorm(acc, gamma, beta):
        # One-pass batch statistics in f32 (sum & sum-of-squares).
        s_lane = jnp.sum(acc, axis=0, keepdims=True)                    # (1, W*C)
        q_lane = jnp.sum(acc * acc, axis=0, keepdims=True)              # (1, W*C)
        mu = jnp.dot(s_lane, g_ref[...],
                     preferred_element_type=jnp.float32) * inv_count    # (1, C)
        ex2 = jnp.dot(q_lane, g_ref[...],
                      preferred_element_type=jnp.float32) * inv_count   # (1, C)
        var = ex2 - mu * mu                                             # biased var
        scale_c = gamma * jax.lax.rsqrt(var + BN_EPS)                   # (1, C)
        shift_c = beta - mu * scale_c                                   # (1, C)
        # Broadcast per-channel scale/shift back onto the lane-fused (w, c) axis.
        scale = jnp.dot(scale_c, gt_ref[...],
                        preferred_element_type=jnp.float32)             # (1, W*C)
        shift = jnp.dot(shift_c, gt_ref[...],
                        preferred_element_type=jnp.float32)             # (1, W*C)
        return acc * scale + shift

    # ---- conv1: single fused bf16 matmul (bias cancelled by BN) ----
    acc1 = jnp.dot(lhs1_ref[...], a1_ref[...],
                   preferred_element_type=jnp.float32)                  # (N*H, W*C) f32

    # ---- BN1 + LeakyReLU(0.2) ----
    y1 = batchnorm(acc1, gamma1_ref[...], beta1_ref[...])
    y1 = jnp.where(y1 >= 0.0, y1, LEAKY_SLOPE * y1)

    # ---- conv2: 3 banded matmuls; H zero-padding via 0/1 row-shift matmuls ----
    y1b = y1.astype(jnp.bfloat16)
    acc2 = jnp.zeros_like(acc1)
    for dh in range(3):
        t = jnp.dot(y1b, a2_ref[dh],
                    preferred_element_type=jnp.float32)                 # (N*H, W*C)
        acc2 = acc2 + jnp.dot(s_ref[dh], t,
                              preferred_element_type=jnp.float32)

    # ---- BN2 + residual add, lane-dense (unmasked) store ----
    y2 = batchnorm(acc2, gamma2_ref[...], beta2_ref[...])
    o_ref[...] = (y2 + x_ref[...]).astype(o_ref.dtype)


# --------------------------------------------------------------------------- #
# Wrapper-side constant builders (pure layout / weight plumbing, XLA-side)     #
# --------------------------------------------------------------------------- #
def _band_weights_conv1(w, W):
    """w: (3,3,Cin,Cout) -> (3*(W+2)*Cin, W*Cout) block-banded matrix.

    Maps the flattened, W-padded input rows (index = dh*(W+2)*Cin + w'*Cin + ci)
    to the flattened output row (index = w*Cout + co)."""
    KH, KW, Cin, Cout = w.shape
    Wp = W + 2
    A = jnp.zeros((KH, Wp, Cin, W, Cout), w.dtype)
    wo = np.arange(W)
    for dh in range(KH):
        for dw in range(KW):
            A = A.at[dh, wo + dw, :, wo, :].set(w[dh, dw])
    return A.reshape(KH * Wp * Cin, W * Cout)


def _band_weights_conv2(w, W):
    """w: (3,3,Cin,Cout) -> (3, W*Cin, W*Cout); W zero-padding folded into the band."""
    KH, KW, Cin, Cout = w.shape
    A = jnp.zeros((KH, W, Cin, W, Cout), w.dtype)
    for dh in range(KH):
        for dw in range(KW):
            wo = np.arange(W)
            wi = wo + dw - 1
            m = (wi >= 0) & (wi < W)
            A = A.at[dh, wi[m], :, wo[m], :].set(w[dh, dw])
    return A.reshape(KH, W * Cin, W * Cout)


def _row_shift_matrices(N, H):
    """(3, N*H, N*H) 0/1 matrices: S[dh] @ rows selects row h+dh-1 of the same
    image (zero outside the image) — i.e. the H zero-padding of a 3x3 conv."""
    S = np.zeros((3, N * H, N * H), np.float32)
    for dh in range(3):
        for n in range(N):
            for h in range(H):
                hi = h + dh - 1
                if 0 <= hi < H:
                    S[dh, n * H + h, n * H + hi] = 1.0
    return jnp.asarray(S)


def _channel_gather(W, C):
    """G (W*C, C): lane (w*C+c) -> channel c reduce;  G^T: channel -> lane broadcast."""
    G = np.tile(np.eye(C, dtype=np.float32), (W, 1))
    return jnp.asarray(G), jnp.asarray(G.T)


# --------------------------------------------------------------------------- #
# Public wrapper                                                               #
# --------------------------------------------------------------------------- #
@jax.jit
def resblock_pallas(x_nhwc, params):
    """x_nhwc: (N, H, W, C) float32. Requires Cin == Cout (residual add)."""
    N, H, W, C = x_nhwc.shape
    w1, b1, g1, be1, w2, b2, g2, be2 = params
    del b1, b2  # conv biases cancel exactly under training-mode BatchNorm

    # conv1 LHS: zero-pad, flatten rows to (W+2)*C lanes, concat the 3 H-shifted
    # slabs on the fused (lane) axis.  All of this is free-ish XLA layout work.
    xpad = jnp.pad(x_nhwc, ((0, 0), (1, 1), (1, 1), (0, 0)))
    xpad_rows = xpad.reshape(N, H + 2, (W + 2) * C)
    lhs1 = jnp.concatenate([xpad_rows[:, dh:dh + H, :] for dh in range(3)], axis=-1)
    lhs1 = lhs1.reshape(N * H, 3 * (W + 2) * C).astype(jnp.bfloat16)

    a1 = _band_weights_conv1(w1, W).astype(jnp.bfloat16)   # (3*(W+2)*C, W*C)
    a2 = _band_weights_conv2(w2, W).astype(jnp.bfloat16)   # (3, W*C, W*C)
    s = _row_shift_matrices(N, H)                          # (3, N*H, N*H)
    G, Gt = _channel_gather(W, C)                          # (W*C, C), (C, W*C)

    x_flat = x_nhwc.reshape(N * H, W * C)                  # lane-dense identity path

    vmem = pl.BlockSpec(memory_space=pltpu.MemorySpace.VMEM)
    out_flat = pl.pallas_call(
        _resblock_kernel,
        out_shape=jax.ShapeDtypeStruct((N * H, W * C), x_nhwc.dtype),
        in_specs=[vmem] * 11,
        out_specs=vmem,
        compiler_params=pltpu.CompilerParams(vmem_limit_bytes=32 * 1024 * 1024),
    )(lhs1, a1, a2, s, G, Gt,
      g1.reshape(1, C), be1.reshape(1, C),
      g2.reshape(1, C), be2.reshape(1, C),
      x_flat)
    return out_flat.reshape(N, H, W, C)


# --------------------------------------------------------------------------- #
# Pure-JAX reference (full f32, includes conv biases) for correctness check    #
# --------------------------------------------------------------------------- #
def resblock_ref(x_nhwc, params):
    w1, b1, g1, be1, w2, b2, g2, be2 = params

    def conv(z, w, b):
        y = jax.lax.conv_general_dilated(
            z, w, window_strides=(1, 1), padding="SAME",
            dimension_numbers=("NHWC", "HWIO", "NHWC"),
            precision=jax.lax.Precision.HIGHEST)
        return y + b.reshape(1, 1, 1, -1)

    def bn(y, g, be):
        m = jnp.mean(y, axis=(0, 1, 2), keepdims=True)
        v = jnp.mean((y - m) ** 2, axis=(0, 1, 2), keepdims=True)
        return (y - m) * jax.lax.rsqrt(v + BN_EPS) * g.reshape(1, 1, 1, -1) \
            + be.reshape(1, 1, 1, -1)

    y = bn(conv(x_nhwc, w1, b1), g1, be1)
    y = jnp.where(y >= 0, y, LEAKY_SLOPE * y)
    y = bn(conv(y, w2, b2), g2, be2)
    return y + x_nhwc


if __name__ == "__main__":
    # ResBlock's residual add requires in_chs == out_chs; use the module default 16.
    N, C, H, W = 2, 16, 16, 16

    key = jax.random.PRNGKey(0)
    ks = jax.random.split(key, 9)

    # Deterministic synthetic parameters (conv1, bn1, conv2, bn2).
    w1 = 0.1 * jax.random.normal(ks[1], (3, 3, C, C), jnp.float32)
    b1 = 0.1 * jax.random.normal(ks[2], (C,), jnp.float32)
    g1 = 1.0 + 0.1 * jax.random.normal(ks[3], (C,), jnp.float32)
    be1 = 0.1 * jax.random.normal(ks[4], (C,), jnp.float32)
    w2 = 0.1 * jax.random.normal(ks[5], (3, 3, C, C), jnp.float32)
    b2 = 0.1 * jax.random.normal(ks[6], (C,), jnp.float32)
    g2 = 1.0 + 0.1 * jax.random.normal(ks[7], (C,), jnp.float32)
    be2 = 0.1 * jax.random.normal(ks[8], (C,), jnp.float32)
    params = (w1, b1, g1, be1, w2, b2, g2, be2)

    # PyTorch-style NCHW input, transposed to NHWC for the kernel.
    x_nchw = jax.random.normal(ks[0], (N, C, H, W), jnp.float32)
    x_nhwc = jnp.transpose(x_nchw, (0, 2, 3, 1))

    out = jax.block_until_ready(resblock_pallas(x_nhwc, params))
    ref = jax.block_until_ready(resblock_ref(x_nhwc, params))

    # Tolerance accounts for bf16 MXU operands (per perf review); accumulation,
    # BatchNorm and all elementwise math remain f32.  Observed error is O(1e-2)
    # absolute worst-case at these magnitudes.
    np.testing.assert_allclose(np.asarray(out), np.asarray(ref),
                               rtol=2e-2, atol=2e-2)

    print("KERNEL_OK")
</pallas_src>

<mosaic_0001>
module attributes {stable_mosaic.version = 11 : i64} {
  func.func @_resblock_kernel(%arg0: memref<32x864xbf16, #tpu.memory_space<vmem>>, %arg1: memref<864x256xbf16, #tpu.memory_space<vmem>>, %arg2: memref<3x256x256xbf16, #tpu.memory_space<vmem>>, %arg3: memref<3x32x32xf32, #tpu.memory_space<vmem>>, %arg4: memref<256x16xf32, #tpu.memory_space<vmem>>, %arg5: memref<16x256xf32, #tpu.memory_space<vmem>>, %arg6: memref<1x16xf32, #tpu.memory_space<vmem>>, %arg7: memref<1x16xf32, #tpu.memory_space<vmem>>, %arg8: memref<1x16xf32, #tpu.memory_space<vmem>>, %arg9: memref<1x16xf32, #tpu.memory_space<vmem>>, %arg10: memref<32x256xf32, #tpu.memory_space<vmem>>, %arg11: memref<32x256xf32, #tpu.memory_space<vmem>>) attributes {dimension_semantics = [], scalar_prefetch = 0 : i64, scratch_operands = 0 : i64, tpu.core_type = #tpu.core_type<tc>} {
    %c0 = arith.constant 0 : index
    %c0_0 = arith.constant 0 : index
    %0 = vector.load %arg0[%c0, %c0_0] : memref<32x864xbf16, #tpu.memory_space<vmem>>, vector<32x864xbf16>
    %c0_1 = arith.constant 0 : index
    %c0_2 = arith.constant 0 : index
    %1 = vector.load %arg1[%c0_1, %c0_2] : memref<864x256xbf16, #tpu.memory_space<vmem>>, vector<864x256xbf16>
    %cst = arith.constant dense<0.000000e+00> : vector<32x256xf32>
    %2 = tpu.matmul %0, %1, %cst {dimension_numbers = #tpu.dot_dimension_numbers<[1], [0], [0], [1], [0, 0, 1, 1], [], []>} : vector<32x864xbf16>, vector<864x256xbf16>, vector<32x256xf32> -> vector<32x256xf32>
    %c0_3 = arith.constant 0 : index
    %c0_4 = arith.constant 0 : index
    %3 = vector.load %arg6[%c0_3, %c0_4] : memref<1x16xf32, #tpu.memory_space<vmem>>, vector<1x16xf32>
    %c0_5 = arith.constant 0 : index
    %c0_6 = arith.constant 0 : index
    %4 = vector.load %arg7[%c0_5, %c0_6] : memref<1x16xf32, #tpu.memory_space<vmem>>, vector<1x16xf32>
    %cst_7 = arith.constant dense<0.000000e+00> : vector<256xf32>
    %5 = vector.multi_reduction <add>, %2, %cst_7 [0] : vector<32x256xf32> to vector<256xf32>
    %6 = vector.shape_cast %5 : vector<256xf32> to vector<1x256xf32>
    %7 = arith.mulf %2, %2 : vector<32x256xf32>
    %cst_8 = arith.constant dense<0.000000e+00> : vector<256xf32>
    %8 = vector.multi_reduction <add>, %7, %cst_8 [0] : vector<32x256xf32> to vector<256xf32>
    %9 = vector.shape_cast %8 : vector<256xf32> to vector<1x256xf32>
    %c0_9 = arith.constant 0 : index
    %c0_10 = arith.constant 0 : index
    %10 = vector.load %arg4[%c0_9, %c0_10] : memref<256x16xf32, #tpu.memory_space<vmem>>, vector<256x16xf32>
    %cst_11 = arith.constant dense<0.000000e+00> : vector<1x16xf32>
    %11 = tpu.matmul %6, %10, %cst_11 {dimension_numbers = #tpu.dot_dimension_numbers<[1], [0], [0], [1], [0, 0, 1, 1], [], []>} : vector<1x256xf32>, vector<256x16xf32>, vector<1x16xf32> -> vector<1x16xf32>
    %cst_12 = arith.constant 0.001953125 : f32
    %12 = vector.broadcast %cst_12 : f32 to vector<1x16xf32>
    %13 = arith.mulf %11, %12 : vector<1x16xf32>
    %c0_13 = arith.constant 0 : index
    %c0_14 = arith.constant 0 : index
    %14 = vector.load %arg4[%c0_13, %c0_14] : memref<256x16xf32, #tpu.memory_space<vmem>>, vector<256x16xf32>
    %cst_15 = arith.constant dense<0.000000e+00> : vector<1x16xf32>
    %15 = tpu.matmul %9, %14, %cst_15 {dimension_numbers = #tpu.dot_dimension_numbers<[1], [0], [0], [1], [0, 0, 1, 1], [], []>} : vector<1x256xf32>, vector<256x16xf32>, vector<1x16xf32> -> vector<1x16xf32>
    %cst_16 = arith.constant 0.001953125 : f32
    %16 = vector.broadcast %cst_16 : f32 to vector<1x16xf32>
    %17 = arith.mulf %15, %16 : vector<1x16xf32>
    %18 = arith.mulf %13, %13 : vector<1x16xf32>
    %19 = arith.subf %17, %18 : vector<1x16xf32>
    %cst_17 = arith.constant 9.99999974E-6 : f32
    %20 = vector.broadcast %cst_17 : f32 to vector<1x16xf32>
    %21 = arith.addf %19, %20 : vector<1x16xf32>
    %22 = math.rsqrt %21 : vector<1x16xf32>
    %23 = arith.mulf %3, %22 : vector<1x16xf32>
    %24 = arith.mulf %13, %23 : vector<1x16xf32>
    %25 = arith.subf %4, %24 : vector<1x16xf32>
    %c0_18 = arith.constant 0 : index
    %c0_19 = arith.constant 0 : index
    %26 = vector.load %arg5[%c0_18, %c0_19] : memref<16x256xf32, #tpu.memory_space<vmem>>, vector<16x256xf32>
    %cst_20 = arith.constant dense<0.000000e+00> : vector<1x256xf32>
    %27 = tpu.matmul %23, %26, %cst_20 {dimension_numbers = #tpu.dot_dimension_numbers<[1], [0], [0], [1], [0, 0, 1, 1], [], []>} : vector<1x16xf32>, vector<16x256xf32>, vector<1x256xf32> -> vector<1x256xf32>
    %c0_21 = arith.constant 0 : index
    %c0_22 = arith.constant 0 : index
    %28 = vector.load %arg5[%c0_21, %c0_22] : memref<16x256xf32, #tpu.memory_space<vmem>>, vector<16x256xf32>
    %cst_23 = arith.constant dense<0.000000e+00> : vector<1x256xf32>
    %29 = tpu.matmul %25, %28, %cst_23 {dimension_numbers = #tpu.dot_dimension_numbers<[1], [0], [0], [1], [0, 0, 1, 1], [], []>} : vector<1x16xf32>, vector<16x256xf32>, vector<1x256xf32> -> vector<1x256xf32>
    %30 = vector.broadcast %27 : vector<1x256xf32> to vector<32x256xf32>
    %31 = arith.mulf %2, %30 : vector<32x256xf32>
    %32 = vector.broadcast %29 : vector<1x256xf32> to vector<32x256xf32>
    %33 = arith.addf %31, %32 : vector<32x256xf32>
    %cst_24 = arith.constant 0.000000e+00 : f32
    %34 = vector.broadcast %cst_24 : f32 to vector<32x256xf32>
    %35 = arith.cmpf oge, %33, %34 : vector<32x256xf32>
    %cst_25 = arith.constant 2.000000e-01 : f32
    %36 = vector.broadcast %cst_25 : f32 to vector<32x256xf32>
    %37 = arith.mulf %36, %33 : vector<32x256xf32>
    %38 = arith.select %35, %33, %37 : vector<32x256xi1>, vector<32x256xf32>
    %39 = arith.truncf %38 : vector<32x256xf32> to vector<32x256xbf16>
    %cst_26 = arith.constant 0.000000e+00 : f32
    %40 = vector.broadcast %cst_26 : f32 to vector<32x256xf32>
    %c0_27 = arith.constant 0 : index
    %c0_28 = arith.constant 0 : index
    %c0_29 = arith.constant 0 : index
    %41 = vector.load %arg2[%c0_27, %c0_28, %c0_29] : memref<3x256x256xbf16, #tpu.memory_space<vmem>>, vector<1x256x256xbf16>
    %42 = vector.shape_cast %41 : vector<1x256x256xbf16> to vector<256x256xbf16>
    %cst_30 = arith.constant dense<0.000000e+00> : vector<32x256xf32>
    %43 = tpu.matmul %39, %42, %cst_30 {dimension_numbers = #tpu.dot_dimension_numbers<[1], [0], [0], [1], [0, 0, 1, 1], [], []>} : vector<32x256xbf16>, vector<256x256xbf16>, vector<32x256xf32> -> vector<32x256xf32>
    %c0_31 = arith.constant 0 : index
    %c0_32 = arith.constant 0 : index
    %c0_33 = arith.constant 0 : index
    %44 = vector.load %arg3[%c0_31, %c0_32, %c0_33] : memref<3x32x32xf32, #tpu.memory_space<vmem>>, vector<1x32x32xf32>
    %45 = vector.shape_cast %44 : vector<1x32x32xf32> to vector<32x32xf32>
    %cst_34 = arith.constant dense<0.000000e+00> : vector<32x256xf32>
    %46 = tpu.matmul %45, %43, %cst_34 {dimension_numbers = #tpu.dot_dimension_numbers<[1], [0], [0], [1], [0, 0, 1, 1], [], []>} : vector<32x32xf32>, vector<32x256xf32>, vector<32x256xf32> -> vector<32x256xf32>
    %47 = arith.addf %40, %46 : vector<32x256xf32>
    %c1 = arith.constant 1 : index
    %c0_35 = arith.constant 0 : index
    %c0_36 = arith.constant 0 : index
    %48 = vector.load %arg2[%c1, %c0_35, %c0_36] : memref<3x256x256xbf16, #tpu.memory_space<vmem>>, vector<1x256x256xbf16>
    %49 = vector.shape_cast %48 : vector<1x256x256xbf16> to vector<256x256xbf16>
    %cst_37 = arith.constant dense<0.000000e+00> : vector<32x256xf32>
    %50 = tpu.matmul %39, %49, %cst_37 {dimension_numbers = #tpu.dot_dimension_numbers<[1], [0], [0], [1], [0, 0, 1, 1], [], []>} : vector<32x256xbf16>, vector<256x256xbf16>, vector<32x256xf32> -> vector<32x256xf32>
    %c1_38 = arith.constant 1 : index
    %c0_39 = arith.constant 0 : index
    %c0_40 = arith.constant 0 : index
    %51 = vector.load %arg3[%c1_38, %c0_39, %c0_40] : memref<3x32x32xf32, #tpu.memory_space<vmem>>, vector<1x32x32xf32>
    %52 = vector.shape_cast %51 : vector<1x32x32xf32> to vector<32x32xf32>
    %cst_41 = arith.constant dense<0.000000e+00> : vector<32x256xf32>
    %53 = tpu.matmul %52, %50, %cst_41 {dimension_numbers = #tpu.dot_dimension_numbers<[1], [0], [0], [1], [0, 0, 1, 1], [], []>} : vector<32x32xf32>, vector<32x256xf32>, vector<32x256xf32> -> vector<32x256xf32>
    %54 = arith.addf %47, %53 : vector<32x256xf32>
    %c2 = arith.constant 2 : index
    %c0_42 = arith.constant 0 : index
    %c0_43 = arith.constant 0 : index
    %55 = vector.load %arg2[%c2, %c0_42, %c0_43] : memref<3x256x256xbf16, #tpu.memory_space<vmem>>, vector<1x256x256xbf16>
    %56 = vector.shape_cast %55 : vector<1x256x256xbf16> to vector<256x256xbf16>
    %cst_44 = arith.constant dense<0.000000e+00> : vector<32x256xf32>
    %57 = tpu.matmul %39, %56, %cst_44 {dimension_numbers = #tpu.dot_dimension_numbers<[1], [0], [0], [1], [0, 0, 1, 1], [], []>} : vector<32x256xbf16>, vector<256x256xbf16>, vector<32x256xf32> -> vector<32x256xf32>
    %c2_45 = arith.constant 2 : index
    %c0_46 = arith.constant 0 : index
    %c0_47 = arith.constant 0 : index
    %58 = vector.load %arg3[%c2_45, %c0_46, %c0_47] : memref<3x32x32xf32, #tpu.memory_space<vmem>>, vector<1x32x32xf32>
    %59 = vector.shape_cast %58 : vector<1x32x32xf32> to vector<32x32xf32>
    %cst_48 = arith.constant dense<0.000000e+00> : vector<32x256xf32>
    %60 = tpu.matmul %59, %57, %cst_48 {dimension_numbers = #tpu.dot_dimension_numbers<[1], [0], [0], [1], [0, 0, 1, 1], [], []>} : vector<32x32xf32>, vector<32x256xf32>, vector<32x256xf32> -> vector<32x256xf32>
    %61 = arith.addf %54, %60 : vector<32x256xf32>
    %c0_49 = arith.constant 0 : index
    %c0_50 = arith.constant 0 : index
    %62 = vector.load %arg8[%c0_49, %c0_50] : memref<1x16xf32, #tpu.memory_space<vmem>>, vector<1x16xf32>
    %c0_51 = arith.constant 0 : index
    %c0_52 = arith.constant 0 : index
    %63 = vector.load %arg9[%c0_51, %c0_52] : memref<1x16xf32, #tpu.memory_space<vmem>>, vector<1x16xf32>
    %cst_53 = arith.constant dense<0.000000e+00> : vector<256xf32>
    %64 = vector.multi_reduction <add>, %61, %cst_53 [0] : vector<32x256xf32> to vector<256xf32>
    %65 = vector.shape_cast %64 : vector<256xf32> to vector<1x256xf32>
    %66 = arith.mulf %61, %61 : vector<32x256xf32>
    %cst_54 = arith.constant dense<0.000000e+00> : vector<256xf32>
    %67 = vector.multi_reduction <add>, %66, %cst_54 [0] : vector<32x256xf32> to vector<256xf32>
    %68 = vector.shape_cast %67 : vector<256xf32> to vector<1x256xf32>
    %c0_55 = arith.constant 0 : index
    %c0_56 = arith.constant 0 : index
    %69 = vector.load %arg4[%c0_55, %c0_56] : memref<256x16xf32, #tpu.memory_space<vmem>>, vector<256x16xf32>
    %cst_57 = arith.constant dense<0.000000e+00> : vector<1x16xf32>
    %70 = tpu.matmul %65, %69, %cst_57 {dimension_numbers = #tpu.dot_dimension_numbers<[1], [0], [0], [1], [0, 0, 1, 1], [], []>} : vector<1x256xf32>, vector<256x16xf32>, vector<1x16xf32> -> vector<1x16xf32>
    %cst_58 = arith.constant 0.001953125 : f32
    %71 = vector.broadcast %cst_58 : f32 to vector<1x16xf32>
    %72 = arith.mulf %70, %71 : vector<1x16xf32>
    %c0_59 = arith.constant 0 : index
    %c0_60 = arith.constant 0 : index
    %73 = vector.load %arg4[%c0_59, %c0_60] : memref<256x16xf32, #tpu.memory_space<vmem>>, vector<256x16xf32>
    %cst_61 = arith.constant dense<0.000000e+00> : vector<1x16xf32>
    %74 = tpu.matmul %68, %73, %cst_61 {dimension_numbers = #tpu.dot_dimension_numbers<[1], [0], [0], [1], [0, 0, 1, 1], [], []>} : vector<1x256xf32>, vector<256x16xf32>, vector<1x16xf32> -> vector<1x16xf32>
    %cst_62 = arith.constant 0.001953125 : f32
    %75 = vector.broadcast %cst_62 : f32 to vector<1x16xf32>
    %76 = arith.mulf %74, %75 : vector<1x16xf32>
    %77 = arith.mulf %72, %72 : vector<1x16xf32>
    %78 = arith.subf %76, %77 : vector<1x16xf32>
    %cst_63 = arith.constant 9.99999974E-6 : f32
    %79 = vector.broadcast %cst_63 : f32 to vector<1x16xf32>
    %80 = arith.addf %78, %79 : vector<1x16xf32>
    %81 = math.rsqrt %80 : vector<1x16xf32>
    %82 = arith.mulf %62, %81 : vector<1x16xf32>
    %83 = arith.mulf %72, %82 : vector<1x16xf32>
    %84 = arith.subf %63, %83 : vector<1x16xf32>
    %c0_64 = arith.constant 0 : index
    %c0_65 = arith.constant 0 : index
    %85 = vector.load %arg5[%c0_64, %c0_65] : memref<16x256xf32, #tpu.memory_space<vmem>>, vector<16x256xf32>
    %cst_66 = arith.constant dense<0.000000e+00> : vector<1x256xf32>
    %86 = tpu.matmul %82, %85, %cst_66 {dimension_numbers = #tpu.dot_dimension_numbers<[1], [0], [0], [1], [0, 0, 1, 1], [], []>} : vector<1x16xf32>, vector<16x256xf32>, vector<1x256xf32> -> vector<1x256xf32>
    %c0_67 = arith.constant 0 : index
    %c0_68 = arith.constant 0 : index
    %87 = vector.load %arg5[%c0_67, %c0_68] : memref<16x256xf32, #tpu.memory_space<vmem>>, vector<16x256xf32>
    %cst_69 = arith.constant dense<0.000000e+00> : vector<1x256xf32>
    %88 = tpu.matmul %84, %87, %cst_69 {dimension_numbers = #tpu.dot_dimension_numbers<[1], [0], [0], [1], [0, 0, 1, 1], [], []>} : vector<1x16xf32>, vector<16x256xf32>, vector<1x256xf32> -> vector<1x256xf32>
    %89 = vector.broadcast %86 : vector<1x256xf32> to vector<32x256xf32>
    %90 = arith.mulf %61, %89 : vector<32x256xf32>
    %91 = vector.broadcast %88 : vector<1x256xf32> to vector<32x256xf32>
    %92 = arith.addf %90, %91 : vector<32x256xf32>
    %c0_70 = arith.constant 0 : index
    %c0_71 = arith.constant 0 : index
    %93 = vector.load %arg10[%c0_70, %c0_71] : memref<32x256xf32, #tpu.memory_space<vmem>>, vector<32x256xf32>
    %94 = arith.addf %92, %93 : vector<32x256xf32>
    %c0_72 = arith.constant 0 : index
    %c0_73 = arith.constant 0 : index
    %95 = vector.load %arg11[%c0_72, %c0_73] : memref<32x256xf32, #tpu.memory_space<vmem>>, vector<32x256xf32>
    tpu.vector_store %arg11[%c0_72, %c0_73], %94 {strides = array<i32>} : memref<32x256xf32, #tpu.memory_space<vmem>>, vector<32x256xf32>,
    return
  }
}

</mosaic_0001>

<bundles_post_ra>
// kernel: resblock_pallas.1
= control target key start
LH: loop header
LB: loop body
LE: loop exit
PB: predicated region body
PF: predicated region fallthrough
CT: control target
= control target key end

     0   :  { %vm773_vm0 = vcmask 785408   ;;  %vm1226_vm4 = vcmask 130048   ;;  %vm1907_vm13 = vcmask 261120   ;;  %s6070_s1 = inlined_call_operand.vmem [shape: bf16[864,256], index: 1, kind: input, shape index: {}]   ;;  %s6071_s0 = inlined_call_operand.vmem [shape: bf16[32,864], index: 0, kind: input, shape index: {}]   ;;  %s6072_s4 = inlined_call_operand.vmem [shape: f32[256,16], index: 4, kind: input, shape index: {}]   ;;  %s6073_s5 = inlined_call_operand.vmem [shape: f32[16,256], index: 5, kind: input, shape index: {}]   ;;  %s6074_s2 = inlined_call_operand.vmem [shape: bf16[3,256,256], index: 2, kind: input, shape index: {}]   ;;  %s6075_s6 = inlined_call_operand.vmem [shape: f32[1,16], index: 6, kind: input, shape index: {}]   ;;  %s6076_s7 = inlined_call_operand.vmem [shape: f32[1,16], index: 7, kind: input, shape index: {}]   ;;  %s6077_s3 = inlined_call_operand.vmem [shape: f32[3,32,32], index: 3, kind: input, shape index: {}]   ;;  %s6078_s8 = inlined_call_operand.vmem [shape: f32[1,16], index: 8, kind: input, shape index: {}]   ;;  %s6079_s9 = inlined_call_operand.vmem [shape: f32[1,16], index: 9, kind: input, shape index: {}]   ;;  %s6080_s10 = inlined_call_operand.vmem [shape: f32[32,256], index: 10, kind: input, shape index: {}]   ;;  %s6081_s11 = inlined_call_operand.vmem [shape: f32[32,256], index: 11, kind: output, shape index: {}]  }
   0x1   :  { %v2792_v0 = vld [vmem:[%s6070_s1 + $0x70] sm:$0xf]  ;;  %v3687_v1 = vld [vmem:[%s6070_s1 + $0x74] sm:$0xf0]  ;;  %v2784_v11 = vld [vmem:[%s6070_s1 + $0x60] sm:$0xf] }
   0x2   :  { %v2856_v2 = vld [vmem:[%s6070_s1 + $0xf0] sm:$0xf]  ;;  %v2793_v3 = vor.u32 %v3687_v1, %v2792_v0  ;;  %v3703_v4 = vld [vmem:[%s6070_s1 + $0xf4] sm:$0xf0]  ;;  %v3685_v13 = vld [vmem:[%s6070_s1 + $0x64] sm:$0xf0] }
   0x3   :  { %v2920_v5 = vld [vmem:[%s6070_s1 + $0x170] sm:$0xf]  ;;  %v3719_v6 = vld [vmem:[%s6070_s1 + $0x174] sm:$0xf0]  ;;  %v2857_v7 = vor.u32 %v3703_v4, %v2856_v2  ;;  %v2848_v14 = vld [vmem:[%s6070_s1 + $0xe0] sm:$0xf]  ;;  %v2785_v16 = vor.u32 %v3685_v13, %v2784_v11 }
   0x4   :  { %v2921_v8 = vor.u32 %v3719_v6, %v2920_v5  ;;  %v2984_v9 = vld [vmem:[%s6070_s1 + $0x1f0] sm:$0xf]  ;;  %v3735_v10 = vld [vmem:[%s6070_s1 + $0x1f4] sm:$0xf0]  ;;  %780 = vmatpush.bf16.msra.mxu0 %v2793_v3  ;;  %v3701_v15 = vld [vmem:[%s6070_s1 + $0xe4] sm:$0xf0] }
   0x5   :  { %v2985_v12 = vor.u32 %v3735_v10, %v2984_v9  ;;  %799 = vmatpush.bf16.msra.mxu1 %v2857_v7  ;;  %v2849_v17 = vor.u32 %v3701_v15, %v2848_v14  ;;  %v2912_v18 = vld [vmem:[%s6070_s1 + $0x160] sm:$0xf]  ;;  %v3717_v19 = vld [vmem:[%s6070_s1 + $0x164] sm:$0xf0]  ;;  %v2776_v23 = vld [vmem:[%s6070_s1 + $0x50] sm:$0xf] }
   0x6   :  { %818 = vmatpush.bf16.msra.mxu2 %v2921_v8  ;;  %v2976_v20 = vld [vmem:[%s6070_s1 + $0x1e0] sm:$0xf]  ;;  %v2913_v21 = vor.u32 %v3717_v19, %v2912_v18  ;;  %v3733_v22 = vld [vmem:[%s6070_s1 + $0x1e4] sm:$0xf0]  ;;  %v3683_v24 = vld [vmem:[%s6070_s1 + $0x54] sm:$0xf0] }
   0x7   :  { %837 = vmatpush.bf16.msra.mxu3 %v2985_v12  ;;  %v2977_v25 = vor.u32 %v3733_v22, %v2976_v20  ;;  %v2840_v26 = vld [vmem:[%s6070_s1 + $0xd0] sm:$0xf]  ;;  %v3699_v27 = vld [vmem:[%s6070_s1 + $0xd4] sm:$0xf0]  ;;  %v2777_v29 = vor.u32 %v3683_v24, %v2776_v23  ;;  %v2768_v35 = vld [vmem:[%s6070_s1 + $0x40] sm:$0xf] }
   0x8   :  { %v2904_v28 = vld [vmem:[%s6070_s1 + $0x150] sm:$0xf]  ;;  %781 = vmatpush.bf16.msra.mxu0 %v2785_v16  ;;  %v3715_v30 = vld [vmem:[%s6070_s1 + $0x154] sm:$0xf0]  ;;  %v2841_v33 = vor.u32 %v3699_v27, %v2840_v26  ;;  %v3681_v36 = vld [vmem:[%s6070_s1 + $0x44] sm:$0xf0] }
   0x9   :  { %v2968_v31 = vld [vmem:[%s6070_s1 + $0x1d0] sm:$0xf]  ;;  %v3731_v32 = vld [vmem:[%s6070_s1 + $0x1d4] sm:$0xf0]  ;;  %800 = vmatpush.bf16.msra.mxu1 %v2849_v17  ;;  %v2905_v34 = vor.u32 %v3715_v30, %v2904_v28  ;;  %v2832_v37 = vld [vmem:[%s6070_s1 + $0xc0] sm:$0xf]  ;;  %v2769_v44 = vor.u32 %v3681_v36, %v2768_v35 }
   0xa   :  { %819 = vmatpush.bf16.msra.mxu2 %v2913_v21  ;;  %v2969_v38 = vor.u32 %v3731_v32, %v2968_v31  ;;  %v3697_v39 = vld [vmem:[%s6070_s1 + $0xc4] sm:$0xf0]  ;;  %v2896_v40 = vld [vmem:[%s6070_s1 + $0x140] sm:$0xf]  ;;  %v2760_v47 = vld [vmem:[%s6070_s1 + $0x30] sm:$0xf] }
   0xb   :  { %838 = vmatpush.bf16.msra.mxu3 %v2977_v25  ;;  %v3713_v41 = vld [vmem:[%s6070_s1 + $0x144] sm:$0xf0]  ;;  %v2960_v42 = vld [vmem:[%s6070_s1 + $0x1c0] sm:$0xf]  ;;  %v2833_v45 = vor.u32 %v3697_v39, %v2832_v37  ;;  %v3679_v48 = vld [vmem:[%s6070_s1 + $0x34] sm:$0xf0] }
   0xc   :  { %v3729_v43 = vld [vmem:[%s6070_s1 + $0x1c4] sm:$0xf0]  ;;  %782 = vmatpush.bf16.msra.mxu0 %v2777_v29  ;;  %v2897_v46 = vor.u32 %v3713_v41, %v2896_v40  ;;  %v2824_v49 = vld [vmem:[%s6070_s1 + $0xb0] sm:$0xf]  ;;  %v3695_v51 = vld [vmem:[%s6070_s1 + $0xb4] sm:$0xf0]  ;;  %v2761_v56 = vor.u32 %v3679_v48, %v2760_v47 }
   0xd   :  { %801 = vmatpush.bf16.msra.mxu1 %v2841_v33  ;;  %v2961_v50 = vor.u32 %v3729_v43, %v2960_v42  ;;  %v2888_v52 = vld [vmem:[%s6070_s1 + $0x130] sm:$0xf]  ;;  %v3711_v53 = vld [vmem:[%s6070_s1 + $0x134] sm:$0xf0]  ;;  %v2825_v57 = vor.u32 %v3695_v51, %v2824_v49  ;;  %v2752_v59 = vld [vmem:[%s6070_s1 + $0x20] sm:$0xf] }
   0xe   :  { %820 = vmatpush.bf16.msra.mxu2 %v2905_v34  ;;  %v2952_v54 = vld [vmem:[%s6070_s1 + $0x1b0] sm:$0xf]  ;;  %v3727_v55 = vld [vmem:[%s6070_s1 + $0x1b4] sm:$0xf0]  ;;  %v2889_v58 = vor.u32 %v3711_v53, %v2888_v52  ;;  %v3677_v60 = vld [vmem:[%s6070_s1 + $0x24] sm:$0xf0] }
   0xf   :  { %839 = vmatpush.bf16.msra.mxu3 %v2969_v38  ;;  %v2816_v61 = vld [vmem:[%s6070_s1 + $0xa0] sm:$0xf]  ;;  %v2953_v62 = vor.u32 %v3727_v55, %v2952_v54  ;;  %v3693_v63 = vld [vmem:[%s6070_s1 + $0xa4] sm:$0xf0]  ;;  %v2753_v4 = vor.u32 %v3677_v60, %v2752_v59  ;;  %v2744_v7 = vld [vmem:[%s6070_s1 + $0x10] sm:$0xf] }
  0x10   :  { %783 = vmatpush.bf16.msra.mxu0 %v2769_v44  ;;  %v2880_v0 = vld [vmem:[%s6070_s1 + $0x120] sm:$0xf]  ;;  %v3709_v1 = vld [vmem:[%s6070_s1 + $0x124] sm:$0xf0]  ;;  %v2817_v5 = vor.u32 %v3693_v63, %v2816_v61  ;;  %v3675_v8 = vld [vmem:[%s6070_s1 + $0x14] sm:$0xf0] }
  0x11   :  { %802 = vmatpush.bf16.msra.mxu1 %v2833_v45  ;;  %v2944_v2 = vld [vmem:[%s6070_s1 + $0x1a0] sm:$0xf]  ;;  %v3725_v3 = vld [vmem:[%s6070_s1 + $0x1a4] sm:$0xf0]  ;;  %v2881_v6 = vor.u32 %v3709_v1, %v2880_v0  ;;  %v2808_v9 = vld [vmem:[%s6070_s1 + $0x90] sm:$0xf]  ;;  %v2745_v17 = vor.u32 %v3675_v8, %v2744_v7 }
  0x12   :  { %821 = vmatpush.bf16.msra.mxu2 %v2897_v46  ;;  %v2945_v10 = vor.u32 %v3725_v3, %v2944_v2  ;;  %v3691_v11 = vld [vmem:[%s6070_s1 + $0x94] sm:$0xf0]  ;;  %v2872_v12 = vld [vmem:[%s6070_s1 + $0x110] sm:$0xf]  ;;  %v2736_v16 = vld [vmem:[%s6070_s1] sm:$0xf] }
  0x13   :  { %840 = vmatpush.bf16.msra.mxu3 %v2961_v50  ;;  %v3707_v13 = vld [vmem:[%s6070_s1 + $0x114] sm:$0xf0]  ;;  %v2936_v14 = vld [vmem:[%s6070_s1 + $0x190] sm:$0xf]  ;;  %v3673_v18 = vld [vmem:[%s6070_s1 + $0x4] sm:$0xf0]  ;;  %v2809_v21 = vor.u32 %v3691_v11, %v2808_v9 }
  0x14   :  { %784 = vmatpush.bf16.msra.mxu0 %v2761_v56  ;;  %v3723_v15 = vld [vmem:[%s6070_s1 + $0x194] sm:$0xf0]  ;;  %v2800_v19 = vld [vmem:[%s6070_s1 + $0x80] sm:$0xf]  ;;  %v3689_v20 = vld [vmem:[%s6070_s1 + $0x84] sm:$0xf0]  ;;  %v2873_v22 = vor.u32 %v3707_v13, %v2872_v12  ;;  %v2737_v34 = vor.u32 %v3673_v18, %v2736_v16 }
  0x15   :  { %803 = vmatpush.bf16.msra.mxu1 %v2825_v57  ;;  %v2864_v23 = vld [vmem:[%s6070_s1 + $0x100] sm:$0xf]  ;;  %v3705_v24 = vld [vmem:[%s6070_s1 + $0x104] sm:$0xf0]  ;;  %v2937_v26 = vor.u32 %v3723_v15, %v2936_v14  ;;  %v3661_v29 = vld [vmem:[%s6071_s0 + $0x18] sm:$0xf0]  ;;  %v2801_v38 = vor.u32 %v3689_v20, %v2800_v19 }
  0x16   :  { %822 = vmatpush.bf16.msra.mxu2 %v2889_v58  ;;  %v2928_v25 = vld [vmem:[%s6070_s1 + $0x180] sm:$0xf]  ;;  %v3721_v27 = vld [vmem:[%s6070_s1 + $0x184] sm:$0xf0]  ;;  %v3658_v30 = vld [vmem:[%s6071_s0 + $0x4] sm:$0xf]  ;;  %v2865_v39 = vor.u32 %v3705_v24, %v2864_v23 }
  0x17   :  { %841 = vmatpush.bf16.msra.mxu3 %v2953_v62  ;;  %v2680_v28 = vld [vmem:[%s6071_s0] sm:$0xf]  ;;  %v3048_v32 = vld [vmem:[%s6070_s1 + $0x270] sm:$0xf]  ;;  %v3751_v33 = vld [vmem:[%s6070_s1 + $0x274] sm:$0xf0]  ;;  %v2929_v43 = vor.u32 %v3721_v27, %v2928_v25 }
  0x18   :  { %785 = vmatpush.bf16.msra.mxu0 %v2753_v4  ;;  %v2682_v31 = vld [vmem:[%s6071_s0 + $0x1c] sm:$0xf0]  ;;  %v2688_v35 = vld [vmem:[%s6071_s0 + $0x8] sm:$0xf]  ;;  %v3112_v36 = vld [vmem:[%s6070_s1 + $0x2f0] sm:$0xf]  ;;  %v3049_v44 = vor.u32 %v3751_v33, %v3048_v32  ;;  %v4213_v48 = vor.u32 %v3661_v29, %v2680_v28 }
  0x19   :  { %804 = vmatpush.bf16.msra.mxu1 %v2817_v5  ;;  %v3767_v37 = vld [vmem:[%s6070_s1 + $0x2f4] sm:$0xf0]  ;;  %v3662_v40 = vld [vmem:[%s6071_s0 + $0x20] sm:$0xf0]  ;;  %v3659_v41 = vld [vmem:[%s6071_s0 + $0xc] sm:$0xf]  ;;  %v4224_v53 = vor.u32 %v3658_v30, %v2682_v31 }
  0x1a   :  { %823 = vmatpush.bf16.msra.mxu2 %v2881_v6  ;;  %v2690_v42 = vld [vmem:[%s6071_s0 + $0x24] sm:$0xf0]  ;;  %v3686_v45 = vld [vmem:[%s6070_s1 + $0x74] sm:$0xf]  ;;  %v3160_v46 = vld [vmem:[%s6070_s1 + $0x350] sm:$0xf]  ;;  %v3113_v49 = vor.u32 %v3767_v37, %v3112_v36  ;;  %v4226_v54 = vor.u32 %v3662_v40, %v2688_v35 }
  0x1b   :  { %842 = vmatpush.bf16.msra.mxu3 %v2945_v10  ;;  %v3779_v47 = vld [vmem:[%s6070_s1 + $0x354] sm:$0xf0]  ;;  %v2794_v50 = vld [vmem:[%s6070_s1 + $0x78] sm:$0xf0]  ;;  %v3040_v51 = vld [vmem:[%s6070_s1 + $0x260] sm:$0xf]  ;;  %v4234_v57 = vor.u32 %v3659_v41, %v2690_v42 }
  0x1c   :  { %786 = vmatpush.bf16.msra.mxu0 %v2745_v17  ;;  %v3749_v52 = vld [vmem:[%s6070_s1 + $0x264] sm:$0xf0]  ;;  %v3104_v55 = vld [vmem:[%s6070_s1 + $0x2e0] sm:$0xf]  ;;  %v3161_v58 = vor.u32 %v3779_v47, %v3160_v46  ;;  %v2797_v59 = vor.u32 %v3686_v45, %v2794_v50  ;;  %v3684_v61 = vld [vmem:[%s6070_s1 + $0x64] sm:$0xf] }
  0x1d   :  { %805 = vmatpush.bf16.msra.mxu1 %v2809_v21  ;;  %v3765_v56 = vld [vmem:[%s6070_s1 + $0x2e4] sm:$0xf0]  ;;  %v3041_v60 = vor.u32 %v3749_v52, %v3040_v51  ;;  %v3152_v62 = vld [vmem:[%s6070_s1 + $0x340] sm:$0xf]  ;;  %v2786_v1 = vld [vmem:[%s6070_s1 + $0x68] sm:$0xf0] }
  0x1e   :  { %824 = vmatpush.bf16.msra.mxu2 %v2873_v22  ;;  %v3777_v63 = vld [vmem:[%s6070_s1 + $0x344] sm:$0xf0]  ;;  %v3105_v0 = vor.u32 %v3765_v56, %v3104_v55  ;;  %v3032_v2 = vld [vmem:[%s6070_s1 + $0x250] sm:$0xf]  ;;  %v3747_v3 = vld [vmem:[%s6070_s1 + $0x254] sm:$0xf0]  ;;  %v2789_v7 = vor.u32 %v3684_v61, %v2786_v1 }
  0x1f   :  { %843 = vmatpush.bf16.msra.mxu3 %v2937_v26  ;;  %v3096_v4 = vld [vmem:[%s6070_s1 + $0x2d0] sm:$0xf]  ;;  %v3763_v5 = vld [vmem:[%s6070_s1 + $0x2d4] sm:$0xf0]  ;;  %v3153_v6 = vor.u32 %v3777_v63, %v3152_v62  ;;  %v3033_v8 = vor.u32 %v3747_v3, %v3032_v2  ;;  %v3682_v9 = vld [vmem:[%s6070_s1 + $0x54] sm:$0xf] }
  0x20   :  { %787 = vmatpush.bf16.msra.mxu0 %v2737_v34  ;;  %v3144_v10 = vld [vmem:[%s6070_s1 + $0x330] sm:$0xf]  ;;  %v3775_v11 = vld [vmem:[%s6070_s1 + $0x334] sm:$0xf0]  ;;  %v3097_v12 = vor.u32 %v3763_v5, %v3096_v4  ;;  %v2778_v13 = vld [vmem:[%s6070_s1 + $0x58] sm:$0xf0] }
  0x21   :  { %806 = vmatpush.bf16.msra.mxu1 %v2801_v38  ;;  %v3024_v14 = vld [vmem:[%s6070_s1 + $0x240] sm:$0xf]  ;;  %v3745_v15 = vld [vmem:[%s6070_s1 + $0x244] sm:$0xf0]  ;;  %v3680_v18 = vld [vmem:[%s6070_s1 + $0x44] sm:$0xf]  ;;  %v3145_v20 = vor.u32 %v3775_v11, %v3144_v10  ;;  %v2781_v21 = vor.u32 %v3682_v9, %v2778_v13 }
  0x22   :  { %825 = vmatpush.bf16.msra.mxu2 %v2865_v39  ;;  %v3088_v16 = vld [vmem:[%s6070_s1 + $0x2c0] sm:$0xf]  ;;  %v3761_v17 = vld [vmem:[%s6070_s1 + $0x2c4] sm:$0xf0]  ;;  %v2770_v19 = vld [vmem:[%s6070_s1 + $0x48] sm:$0xf0]  ;;  %v3025_v22 = vor.u32 %v3745_v15, %v3024_v14 }
  0x23   :  { %844 = vmatpush.bf16.msra.mxu3 %v2929_v43  ;;  %788 = vmatmul.bf16.vlgmr.msra.gmra.mxu0 %v4213_v48  ;;  %v2708_v23 = vld [vmem:[%s6071_s0 + $0x38] sm:$0xf]  ;;  %v3668_v24 = vld [vmem:[%s6071_s0 + $0x50] sm:$0xf0]  ;;  %v3136_v25 = vld [vmem:[%s6070_s1 + $0x320] sm:$0xf]  ;;  %v3089_v27 = vor.u32 %v3761_v17, %v3088_v16  ;;  %v2773_v39 = vor.u32 %v3680_v18, %v2770_v19 }
  0x24   :  { %856 = vmatpush.bf16.msrb.mxu0 %v3049_v44  ;;  %807 = vmatmul.bf16.vlgmr.msra.gmra.mxu1 %v4224_v53  ;;  %v3773_v26 = vld [vmem:[%s6070_s1 + $0x324] sm:$0xf0]  ;;  %v3665_v28 = vld [vmem:[%s6071_s0 + $0x3c] sm:$0xf]  ;;  %v2710_v29 = vld [vmem:[%s6071_s0 + $0x54] sm:$0xf0]  ;;  %v4345_v44 = vor.u32 %v3668_v24, %v2708_v23 }
  0x25   :  { %875 = vmatpush.bf16.msrb.mxu1 %v3113_v49  ;;  %826 = vmatmul.bf16.vlgmr.msra.gmra.mxu2 %v4226_v54  ;;  %v3016_v30 = vld [vmem:[%s6070_s1 + $0x230] sm:$0xf]  ;;  %v3743_v31 = vld [vmem:[%s6070_s1 + $0x234] sm:$0xf0]  ;;  %v2716_v32 = vld [vmem:[%s6071_s0 + $0x40] sm:$0xf]  ;;  %v3137_v38 = vor.u32 %v3773_v26, %v3136_v25  ;;  %v4356_v50 = vor.u32 %v3665_v28, %v2710_v29 }
  0x26   :  { %845 = vmatmul.bf16.vlgmr.msra.gmra.mxu3 %v4234_v57  ;;  %896 = vmatpush.bf16.msrb.mxu2 %v3161_v58  ;;  %v3080_v33 = vld [vmem:[%s6070_s1 + $0x2b0] sm:$0xf]  ;;  %v3759_v34 = vld [vmem:[%s6070_s1 + $0x2b4] sm:$0xf0]  ;;  %v3669_v35 = vld [vmem:[%s6071_s0 + $0x58] sm:$0xf0]  ;;  %v3017_v40 = vor.u32 %v3743_v31, %v3016_v30 }
  0x27   :  { %913 = vmatpush.bf16.msrb.mxu3 %v2797_v59  ;;  %v3666_v36 = vld [vmem:[%s6071_s0 + $0x44] sm:$0xf]  ;;  %v2718_v37 = vld [vmem:[%s6071_s0 + $0x5c] sm:$0xf0]  ;;  %v3678_v41 = vld [vmem:[%s6070_s1 + $0x34] sm:$0xf]  ;;  %v3081_v45 = vor.u32 %v3759_v34, %v3080_v33  ;;  %v4358_v51 = vor.u32 %v3669_v35, %v2716_v32 }
  0x28   :  { %857 = vmatpush.bf16.msrb.mxu0 %v3041_v60  ;;  %v3128_v42 = vld [vmem:[%s6070_s1 + $0x310] sm:$0xf]  ;;  %v3771_v43 = vld [vmem:[%s6070_s1 + $0x314] sm:$0xf0]  ;;  %v2762_v46 = vld [vmem:[%s6070_s1 + $0x38] sm:$0xf0]  ;;  %v4366_v56 = vor.u32 %v3666_v36, %v2718_v37 }
  0x29   :  { %876 = vmatpush.bf16.msrb.mxu1 %v3105_v0  ;;  %v3008_v47 = vld [vmem:[%s6070_s1 + $0x220] sm:$0xf]  ;;  %v3741_v49 = vld [vmem:[%s6070_s1 + $0x224] sm:$0xf0]  ;;  %v3676_v58 = vld [vmem:[%s6070_s1 + $0x24] sm:$0xf]  ;;  %v3129_v59 = vor.u32 %v3771_v43, %v3128_v42  ;;  %v2765_v60 = vor.u32 %v3678_v41, %v2762_v46 }
  0x2a   :  { %897 = vmatpush.bf16.msrb.mxu2 %v3153_v6  ;;  %v3072_v52 = vld [vmem:[%s6070_s1 + $0x2a0] sm:$0xf]  ;;  %v3757_v55 = vld [vmem:[%s6070_s1 + $0x2a4] sm:$0xf0]  ;;  %v3009_v61 = vor.u32 %v3741_v49, %v3008_v47  ;;  %v2754_v62 = vld [vmem:[%s6070_s1 + $0x28] sm:$0xf0] }
  0x2b   :  { %914 = vmatpush.bf16.msrb.mxu3 %v2789_v7  ;;  %v3120_v63 = vld [vmem:[%s6070_s1 + $0x300] sm:$0xf]  ;;  %v3769_v0 = vld [vmem:[%s6070_s1 + $0x304] sm:$0xf0]  ;;  %v3073_v1 = vor.u32 %v3757_v55, %v3072_v52  ;;  %v3000_v2 = vld [vmem:[%s6070_s1 + $0x210] sm:$0xf]  ;;  %v2757_v9 = vor.u32 %v3676_v58, %v2754_v62 }
  0x2c   :  { %858 = vmatpush.bf16.msrb.mxu0 %v3033_v8  ;;  %v3739_v3 = vld [vmem:[%s6070_s1 + $0x214] sm:$0xf0]  ;;  %v3064_v4 = vld [vmem:[%s6070_s1 + $0x290] sm:$0xf]  ;;  %v3734_v6 = vld [vmem:[%s6070_s1 + $0x1f4] sm:$0xf]  ;;  %v3121_v8 = vor.u32 %v3769_v0, %v3120_v63 }
  0x2d   :  { %877 = vmatpush.bf16.msrb.mxu1 %v3097_v12  ;;  %v3755_v5 = vld [vmem:[%s6070_s1 + $0x294] sm:$0xf0]  ;;  %v2986_v7 = vld [vmem:[%s6070_s1 + $0x1f8] sm:$0xf0]  ;;  %v3001_v10 = vor.u32 %v3739_v3, %v3000_v2  ;;  %v3674_v11 = vld [vmem:[%s6070_s1 + $0x14] sm:$0xf] }
  0x2e   :  { %898 = vmatpush.bf16.msrb.mxu2 %v3145_v20  ;;  %v2746_v12 = vld [vmem:[%s6070_s1 + $0x18] sm:$0xf0]  ;;  %v2992_v13 = vld [vmem:[%s6070_s1 + $0x200] sm:$0xf]  ;;  %v3065_v14 = vor.u32 %v3755_v5, %v3064_v4  ;;  %v3737_v15 = vld [vmem:[%s6070_s1 + $0x204] sm:$0xf0]  ;;  %v2989_v18 = vor.u32 %v3734_v6, %v2986_v7 }
  0x2f   :  { %915 = vmatpush.bf16.msrb.mxu3 %v2781_v21  ;;  %v3056_v16 = vld [vmem:[%s6070_s1 + $0x280] sm:$0xf]  ;;  %v3753_v17 = vld [vmem:[%s6070_s1 + $0x284] sm:$0xf0]  ;;  %v3702_v19 = vld [vmem:[%s6070_s1 + $0xf4] sm:$0xf]  ;;  %v2749_v25 = vor.u32 %v3674_v11, %v2746_v12  ;;  %v2993_v26 = vor.u32 %v3737_v15, %v2992_v13 }
  0x30   :  { %859 = vmatpush.bf16.msrb.mxu0 %v3025_v22  ;;  %v2858_v20 = vld [vmem:[%s6070_s1 + $0xf8] sm:$0xf0]  ;;  %v3718_v21 = vld [vmem:[%s6070_s1 + $0x174] sm:$0xf]  ;;  %v3732_v23 = vld [vmem:[%s6070_s1 + $0x1e4] sm:$0xf]  ;;  %v3057_v28 = vor.u32 %v3753_v17, %v3056_v16 }
  0x31   :  { %878 = vmatpush.bf16.msrb.mxu1 %v3089_v27  ;;  %v2922_v22 = vld [vmem:[%s6070_s1 + $0x178] sm:$0xf0]  ;;  %v2978_v24 = vld [vmem:[%s6070_s1 + $0x1e8] sm:$0xf0]  ;;  %v3672_v27 = vld [vmem:[%s6070_s1 + $0x4] sm:$0xf]  ;;  %v2861_v32 = vor.u32 %v3702_v19, %v2858_v20 }
  0x32   :  { %899 = vmatpush.bf16.msrb.mxu2 %v3137_v38  ;;  %v2738_v29 = vld [vmem:[%s6070_s1 + $0x8] sm:$0xf0]  ;;  %v2696_v30 = vld [vmem:[%s6071_s0 + $0x10] sm:$0xf]  ;;  %v3660_v33 = vld [vmem:[%s6071_s0 + $0x14] sm:$0xf]  ;;  %v2925_v34 = vor.u32 %v3718_v21, %v2922_v22  ;;  %v2981_v37 = vor.u32 %v3732_v23, %v2978_v24 }
  0x33   :  { %916 = vmatpush.bf16.msrb.mxu3 %v2773_v39  ;;  %793 = vmatmul.bf16.gmra.mxu0 %v4345_v44  ;;  %v3663_v31 = vld [vmem:[%s6071_s0 + $0x28] sm:$0xf0]  ;;  %v3750_v35 = vld [vmem:[%s6070_s1 + $0x274] sm:$0xf]  ;;  %v3050_v36 = vld [vmem:[%s6070_s1 + $0x278] sm:$0xf0]  ;;  %v2741_v41 = vor.u32 %v3672_v27, %v2738_v29 }
  0x34   :  { %860 = vmatpush.bf16.msrb.mxu0 %v3017_v40  ;;  %812 = vmatmul.bf16.gmra.mxu1 %v4356_v50  ;;  %v2698_v38 = vld [vmem:[%s6071_s0 + $0x2c] sm:$0xf0]  ;;  %v2704_v39 = vld [vmem:[%s6071_s0 + $0x18] sm:$0xf]  ;;  %v3664_v40 = vld [vmem:[%s6071_s0 + $0x30] sm:$0xf0]  ;;  %v4477_v46 = vor.u32 %v3663_v31, %v2696_v30  ;;  %v3053_v47 = vor.u32 %v3750_v35, %v3050_v36 }
  0x35   :  { %879 = vmatpush.bf16.msrb.mxu1 %v3081_v45  ;;  %831 = vmatmul.bf16.gmra.mxu2 %v4358_v51  ;;  %v3700_v42 = vld [vmem:[%s6070_s1 + $0xe4] sm:$0xf]  ;;  %v2850_v43 = vld [vmem:[%s6070_s1 + $0xe8] sm:$0xf0]  ;;  %v3730_v52 = vld [vmem:[%s6070_s1 + $0x1d4] sm:$0xf]  ;;  %v4488_v58 = vor.u32 %v3660_v33, %v2698_v38 }
  0x36   :  { %850 = vmatmul.bf16.gmra.mxu3 %v4366_v56  ;;  %900 = vmatpush.bf16.msrb.mxu2 %v3129_v59  ;;  %v3716_v45 = vld [vmem:[%s6070_s1 + $0x164] sm:$0xf]  ;;  %v2914_v49 = vld [vmem:[%s6070_s1 + $0x168] sm:$0xf0]  ;;  %v2970_v55 = vld [vmem:[%s6070_s1 + $0x1d8] sm:$0xf0]  ;;  %v4490_v59 = vor.u32 %v3664_v40, %v2704_v39  ;;  %v2853_v62 = vor.u32 %v3700_v42, %v2850_v43 }
  0x37   :  { %917 = vmatpush.bf16.msrb.mxu3 %v2765_v60  ;;  %v3748_v60 = vld [vmem:[%s6070_s1 + $0x264] sm:$0xf]  ;;  %v2917_v63 = vor.u32 %v3716_v45, %v2914_v49  ;;  %v3698_v0 = vld [vmem:[%s6070_s1 + $0xd4] sm:$0xf]  ;;  %v2973_v3 = vor.u32 %v3730_v52, %v2970_v55  ;;  %v2906_v5 = vld [vmem:[%s6070_s1 + $0x158] sm:$0xf0] }
  0x38   :  { %861 = vmatpush.bf16.msrb.mxu0 %v3009_v61  ;;  %v3042_v61 = vld [vmem:[%s6070_s1 + $0x268] sm:$0xf0]  ;;  %v3714_v2 = vld [vmem:[%s6070_s1 + $0x154] sm:$0xf]  ;;  %v3728_v6 = vld [vmem:[%s6070_s1 + $0x1c4] sm:$0xf] }
  0x39   :  { %880 = vmatpush.bf16.msrb.mxu1 %v3073_v1  ;;  %v2842_v1 = vld [vmem:[%s6070_s1 + $0xd8] sm:$0xf0]  ;;  %v3045_v4 = vor.u32 %v3748_v60, %v3042_v61  ;;  %v2962_v7 = vld [vmem:[%s6070_s1 + $0x1c8] sm:$0xf0]  ;;  %v2909_v11 = vor.u32 %v3714_v2, %v2906_v5  ;;  %v3696_v12 = vld [vmem:[%s6070_s1 + $0xc4] sm:$0xf] }
  0x3a   :  { %901 = vmatpush.bf16.msrb.mxu2 %v3121_v8  ;;  %v3746_v8 = vld [vmem:[%s6070_s1 + $0x254] sm:$0xf]  ;;  %v2834_v13 = vld [vmem:[%s6070_s1 + $0xc8] sm:$0xf0]  ;;  %v2965_v15 = vor.u32 %v3728_v6, %v2962_v7  ;;  %v3744_v19 = vld [vmem:[%s6070_s1 + $0x244] sm:$0xf] }
  0x3b   :  { %918 = vmatpush.bf16.msrb.mxu3 %v2757_v9  ;;  %v3034_v9 = vld [vmem:[%s6070_s1 + $0x258] sm:$0xf0]  ;;  %v2898_v16 = vld [vmem:[%s6070_s1 + $0x148] sm:$0xf0]  ;;  %v3726_v17 = vld [vmem:[%s6070_s1 + $0x1b4] sm:$0xf]  ;;  %v2837_v21 = vor.u32 %v3696_v12, %v2834_v13 }
  0x3c   :  { %862 = vmatpush.bf16.msrb.mxu0 %v3001_v10  ;;  %v2845_v10 = vor.u32 %v3698_v0, %v2842_v1  ;;  %v3026_v20 = vld [vmem:[%s6070_s1 + $0x248] sm:$0xf0]  ;;  %v2724_v23 = vld [vmem:[%s6071_s0 + $0x48] sm:$0xf]  ;;  %v3670_v24 = vld [vmem:[%s6071_s0 + $0x60] sm:$0xf0] }
  0x3d   :  { %881 = vmatpush.bf16.msrb.mxu1 %v3065_v14  ;;  %v3712_v14 = vld [vmem:[%s6070_s1 + $0x144] sm:$0xf]  ;;  %v3710_v27 = vld [vmem:[%s6070_s1 + $0x134] sm:$0xf]  ;;  %v3029_v29 = vor.u32 %v3744_v19, %v3026_v20  ;;  %v2890_v30 = vld [vmem:[%s6070_s1 + $0x138] sm:$0xf0] }
  0x3e   :  { %970 = vmatpush.bf16.msra.mxu2 %v2989_v18  ;;  %v2954_v18 = vld [vmem:[%s6070_s1 + $0x1b8] sm:$0xf0]  ;;  %v2901_v22 = vor.u32 %v3712_v14, %v2898_v16  ;;  %v3724_v31 = vld [vmem:[%s6070_s1 + $0x1a4] sm:$0xf]  ;;  %v3667_v33 = vld [vmem:[%s6071_s0 + $0x4c] sm:$0xf]  ;;  %v2893_v40 = vor.u32 %v3710_v27, %v2890_v30 }
  0x3f   :  { %919 = vmatpush.bf16.msrb.mxu3 %v2749_v25  ;;  %v3694_v25 = vld [vmem:[%s6070_s1 + $0xb4] sm:$0xf]  ;;  %v3018_v35 = vld [vmem:[%s6070_s1 + $0x238] sm:$0xf0]  ;;  %v2726_v36 = vld [vmem:[%s6071_s0 + $0x64] sm:$0xf0] }
  0x40   :  { %863 = vmatpush.bf16.msrb.mxu0 %v2993_v26  ;;  %v2826_v26 = vld [vmem:[%s6070_s1 + $0xb8] sm:$0xf0]  ;;  %v3671_v38 = vld [vmem:[%s6071_s0 + $0x68] sm:$0xf0]  ;;  %v3708_v43 = vld [vmem:[%s6070_s1 + $0x124] sm:$0xf]  ;;  %v4613_v61 = vor.u32 %v3667_v33, %v2726_v36 }
  0x41   :  { %882 = vmatpush.bf16.msrb.mxu1 %v3057_v28  ;;  %v2957_v28 = vor.u32 %v3726_v17, %v2954_v18  ;;  %v2829_v39 = vor.u32 %v3694_v25, %v2826_v26  ;;  %v2818_v42 = vld [vmem:[%s6070_s1 + $0xa8] sm:$0xf0]  ;;  %v3722_v55 = vld [vmem:[%s6070_s1 + $0x194] sm:$0xf]  ;;  %v2938_v60 = vld [vmem:[%s6070_s1 + $0x198] sm:$0xf0] }
  0x42   :  { %971 = vmatpush.bf16.msra.mxu2 %v2981_v37  ;;  %v2732_v37 = vld [vmem:[%s6071_s0 + $0x50] sm:$0xf]  ;;  %v2882_v52 = vld [vmem:[%s6070_s1 + $0x128] sm:$0xf0]  ;;  %v3706_v5 = vld [vmem:[%s6070_s1 + $0x114] sm:$0xf]  ;;  %v2941_v6 = vor.u32 %v3722_v55, %v2938_v60 }
  0x43   :  { %920 = vmatpush.bf16.msrb.mxu3 %v2741_v41  ;;  %864 = vmatmul.bf16.vlgmr.msrb.gmra.mxu0 %v4477_v46  ;;  %v3692_v41 = vld [vmem:[%s6070_s1 + $0xa4] sm:$0xf]  ;;  %v3010_v0 = vld [vmem:[%s6070_s1 + $0x228] sm:$0xf0]  ;;  %v2885_v2 = vor.u32 %v3708_v43, %v2882_v52  ;;  %v3002_v12 = vld [vmem:[%s6070_s1 + $0x218] sm:$0xf0] }
  0x44   :  { %932 = vmatpush.bf16.msra.mxu0 %v2861_v32  ;;  %883 = vmatmul.bf16.vlgmr.msrb.gmra.mxu1 %v4488_v58  ;;  %v2946_v32 = vld [vmem:[%s6070_s1 + $0x1a8] sm:$0xf0]  ;;  %v2821_v1 = vor.u32 %v3692_v41, %v2818_v42  ;;  %v3688_v14 = vld [vmem:[%s6070_s1 + $0x84] sm:$0xf]  ;;  %v3766_v20 = vld [vmem:[%s6070_s1 + $0x2f4] sm:$0xf] }
  0x45   :  { %951 = vmatpush.bf16.msra.mxu1 %v2925_v34  ;;  %3166 = vmatmul.msk.bf16.vlgmr.msrb.gmra.mxu2 %vm773_vm0, %v4490_v59  ;;  %v3742_v34 = vld [vmem:[%s6070_s1 + $0x234] sm:$0xf]  ;;  %v2949_v45 = vor.u32 %v3724_v31, %v2946_v32  ;;  %v3704_v16 = vld [vmem:[%s6070_s1 + $0x104] sm:$0xf]  ;;  %v3106_v30 = vld [vmem:[%s6070_s1 + $0x2e8] sm:$0xf0] }
  0x46   :  { %921 = vmatmul.bf16.vlgmr.msrb.gmra.mxu3 %v4213_v48  ;;  %972 = vmatpush.bf16.msra.mxu2 %v2973_v3  ;;  %v3037_v48 = vor.u32 %v3746_v8, %v3034_v9  ;;  %v3021_v49 = vor.u32 %v3742_v34, %v3018_v35  ;;  %v3690_v3 = vld [vmem:[%s6070_s1 + $0x94] sm:$0xf]  ;;  %v2874_v8 = vld [vmem:[%s6070_s1 + $0x118] sm:$0xf0]  ;;  %v3720_v9 = vld [vmem:[%s6070_s1 + $0x184] sm:$0xf] }
  0x47   :  { %989 = vmatpush.bf16.msra.mxu3 %v3053_v47  ;;  %v4602_v47 = vor.u32 %v3670_v24, %v2724_v23  ;;  %v3736_v19 = vld [vmem:[%s6070_s1 + $0x204] sm:$0xf]  ;;  %v3778_v23 = vld [vmem:[%s6070_s1 + $0x354] sm:$0xf]  ;;  %v3162_v24 = vld [vmem:[%s6070_s1 + $0x358] sm:$0xf0] }
  0x48   :  { %933 = vmatpush.bf16.msra.mxu0 %v2853_v62  ;;  %v4615_v62 = vor.u32 %v3671_v38, %v2732_v37  ;;  %v3165_v31 = vor.u32 %v3778_v23, %v3162_v24  ;;  %v3776_v32 = vld [vmem:[%s6070_s1 + $0x344] sm:$0xf]  ;;  %v3154_v33 = vld [vmem:[%s6070_s1 + $0x348] sm:$0xf0]  ;;  %v3762_v35 = vld [vmem:[%s6070_s1 + $0x2d4] sm:$0xf] }
  0x49   :  { %952 = vmatpush.bf16.msra.mxu1 %v2917_v63  ;;  %v3740_v63 = vld [vmem:[%s6070_s1 + $0x224] sm:$0xf]  ;;  %v3098_v36 = vld [vmem:[%s6070_s1 + $0x2d8] sm:$0xf0]  ;;  %v3157_v37 = vor.u32 %v3776_v32, %v3154_v33  ;;  %v3774_v38 = vld [vmem:[%s6070_s1 + $0x334] sm:$0xf] }
  0x4a   :  { %973 = vmatpush.bf16.msra.mxu2 %v2965_v15  ;;  %v3013_v7 = vor.u32 %v3740_v63, %v3010_v0  ;;  %v2877_v15 = vor.u32 %v3706_v5, %v2874_v8  ;;  %v3760_v41 = vld [vmem:[%s6070_s1 + $0x2c4] sm:$0xf]  ;;  %v3090_v42 = vld [vmem:[%s6070_s1 + $0x2c8] sm:$0xf0]  ;;  %v3758_v52 = vld [vmem:[%s6070_s1 + $0x2b4] sm:$0xf] }
  0x4b   :  { %990 = vmatpush.bf16.msra.mxu3 %v3045_v4  ;;  %v2810_v4 = vld [vmem:[%s6070_s1 + $0x98] sm:$0xf0]  ;;  %v3770_v55 = vld [vmem:[%s6070_s1 + $0x314] sm:$0xf]  ;;  %v3756_v63 = vld [vmem:[%s6070_s1 + $0x2a4] sm:$0xf] }
  0x4c   :  { %934 = vmatpush.bf16.msra.mxu0 %v2845_v10  ;;  %v2930_v10 = vld [vmem:[%s6070_s1 + $0x188] sm:$0xf0]  ;;  %v2813_v13 = vor.u32 %v3690_v3, %v2810_v4  ;;  %v3754_v5 = vld [vmem:[%s6070_s1 + $0x294] sm:$0xf]  ;;  %v1100_v23 = vld [vmem:[%s6072_s4 + $0x40] sm:$0xff] }
  0x4d   :  { %953 = vmatpush.bf16.msra.mxu1 %v2909_v11  ;;  %v3738_v11 = vld [vmem:[%s6070_s1 + $0x214] sm:$0xf]  ;;  %v2933_v17 = vor.u32 %v3720_v9, %v2930_v10  ;;  %v3074_v0 = vld [vmem:[%s6070_s1 + $0x2a8] sm:$0xf0]  ;;  %v3752_v9 = vld [vmem:[%s6070_s1 + $0x284] sm:$0xf] }
  0x4e   :  { %974 = vmatpush.bf16.msra.mxu2 %v2957_v28  ;;  %v3005_v18 = vor.u32 %v3738_v11, %v3002_v12  ;;  %v3122_v3 = vld [vmem:[%s6070_s1 + $0x308] sm:$0xf0]  ;;  %v3077_v4 = vor.u32 %v3756_v63, %v3074_v0 }
  0x4f   :  { %991 = vmatpush.bf16.msra.mxu3 %v3037_v48  ;;  %v2802_v48 = vld [vmem:[%s6070_s1 + $0x88] sm:$0xf0] }
  0x50   :  { %935 = vmatpush.bf16.msra.mxu0 %v2837_v21  ;;  %v3114_v21 = vld [vmem:[%s6070_s1 + $0x2f8] sm:$0xf0]  ;;  %v2805_v25 = vor.u32 %v3688_v14, %v2802_v48  ;;  %v3058_v10 = vld [vmem:[%s6070_s1 + $0x288] sm:$0xf0] }
  0x51   :  { %954 = vmatpush.bf16.msra.mxu1 %v2901_v22  ;;  %v2994_v22 = vld [vmem:[%s6070_s1 + $0x208] sm:$0xf0]  ;;  %v3117_v27 = vor.u32 %v3766_v20, %v3114_v21  ;;  %v3061_v11 = vor.u32 %v3752_v9, %v3058_v10  ;;  %v1102_v21 = vld [vmem:[%s6072_s4 + $0x50] sm:$0xff] }
  0x52   :  { %975 = vmatpush.bf16.msra.mxu2 %v2949_v45  ;;  %v2997_v28 = vor.u32 %v3736_v19, %v2994_v22  ;;  %v3772_v45 = vld [vmem:[%s6070_s1 + $0x324] sm:$0xf]  ;;  %v1105_v48 = vld [vmem:[%s6072_s4 + $0x68] sm:$0xff] }
  0x53   :  { %992 = vmatpush.bf16.msra.mxu3 %v3029_v29  ;;  %869 = vmatmul.bf16.gmra.mxu0 %v4602_v47  ;;  %v3764_v29 = vld [vmem:[%s6070_s1 + $0x2e4] sm:$0xf]  ;;  %v1101_v22 = vld [vmem:[%s6072_s4 + $0x48] sm:$0xff] }
  0x54   :  { %936 = vmatpush.bf16.msra.mxu0 %v2829_v39  ;;  %888 = vmatmul.bf16.gmra.mxu1 %v4613_v61  ;;  %v3109_v34 = vor.u32 %v3764_v29, %v3106_v30  ;;  %v3146_v39 = vld [vmem:[%s6070_s1 + $0x338] sm:$0xf0]  ;;  %v1097_v30 = vld [vmem:[%s6072_s4 + $0x28] sm:$0xff] }
  0x55   :  { %955 = vmatpush.bf16.msra.mxu1 %v2893_v40  ;;  %3167 = vmatmul.msk.bf16.gmra.mxu2 %vm773_vm0, %v4615_v62  ;;  %v3101_v40 = vor.u32 %v3762_v35, %v3098_v36  ;;  %v3149_v43 = vor.u32 %v3774_v38, %v3146_v39  ;;  %v1093_v38 = vld [vmem:[%s6072_s4 + $0x8] sm:$0xff] }
  0x56   :  { %926 = vmatmul.bf16.gmra.mxu3 %v4345_v44  ;;  %976 = vmatpush.bf16.msra.mxu2 %v2941_v6  ;;  %v2866_v44 = vld [vmem:[%s6070_s1 + $0x108] sm:$0xf0]  ;;  %v3066_v6 = vld [vmem:[%s6070_s1 + $0x298] sm:$0xf0] }
  0x57   :  { %993 = vmatpush.bf16.msra.mxu3 %v3021_v49  ;;  %v2869_v26 = vor.u32 %v3704_v16, %v2866_v44  ;;  %v3093_v49 = vor.u32 %v3760_v41, %v3090_v42  ;;  %v3069_v8 = vor.u32 %v3754_v5, %v3066_v6  ;;  %v1104_v16 = vld [vmem:[%s6072_s4 + $0x60] sm:$0xff] }
  0x58   :  { %937 = vmatpush.bf16.msra.mxu0 %v2821_v1 }
  0x59   :  { %956 = vmatpush.bf16.msra.mxu1 %v2885_v2  ;;  %v3768_v2 = vld [vmem:[%s6070_s1 + $0x304] sm:$0xf] }
  0x5a   :  { %977 = vmatpush.bf16.msra.mxu2 %v2933_v17 }
  0x5b   :  { %994 = vmatpush.bf16.msra.mxu3 %v3013_v7  ;;  %v3125_v7 = vor.u32 %v3768_v2, %v3122_v3 }
  0x5c   :  { %938 = vmatpush.bf16.msra.mxu0 %v2813_v13 }
  0x5d   :  { %957 = vmatpush.bf16.msra.mxu1 %v2877_v15 }
  0x5f   :  { %995 = vmatpush.bf16.msra.mxu3 %v3005_v18  ;;  %v1103_v18 = vld [vmem:[%s6072_s4 + $0x58] sm:$0xff] }
  0x60   :  { %939 = vmatpush.bf16.msra.mxu0 %v2805_v25 }
  0x61   :  { %958 = vmatpush.bf16.msra.mxu1 %v2869_v26  ;;  %v1099_v26 = vld [vmem:[%s6072_s4 + $0x38] sm:$0xff] }
  0x63   :  { %996 = vmatpush.bf16.msra.mxu3 %v2997_v28  ;;  %940 = vmatmul.bf16.vlgmr.msra.gmra.mxu0 %v4224_v53  ;;  %v3138_v53 = vld [vmem:[%s6070_s1 + $0x328] sm:$0xf0]  ;;  %v1098_v28 = vld [vmem:[%s6072_s4 + $0x30] sm:$0xff] }
  0x64   :  { %1008 = vmatpush.bf16.msrb.mxu0 %v3117_v27  ;;  %959 = vmatmul.bf16.vlgmr.msra.gmra.mxu1 %v4226_v54  ;;  %v3082_v54 = vld [vmem:[%s6070_s1 + $0x2b8] sm:$0xf0] }
  0x65   :  { %1029 = vmatpush.bf16.msrb.mxu1 %v3165_v31  ;;  %978 = vmatmul.bf16.vlgmr.msra.gmra.mxu2 %v4234_v57  ;;  %v3141_v57 = vor.u32 %v3772_v45, %v3138_v53  ;;  %v3085_v60 = vor.u32 %v3758_v52, %v3082_v54  ;;  %v1096_v31 = vld [vmem:[%s6072_s4 + $0x20] sm:$0xff] }
  0x66   :  { %997 = vmatmul.bf16.vlgmr.msra.gmra.mxu3 %v4477_v46  ;;  %v3130_v46 = vld [vmem:[%s6070_s1 + $0x318] sm:$0xf0]  ;;  %v1092_v53 = vld [vmem:[%s6072_s4] sm:$0xff] }
  0x67   :  { %v3133_v1 = vor.u32 %v3770_v55, %v3130_v46 }
  0x68   :  { %1009 = vmatpush.bf16.msrb.mxu0 %v3109_v34  ;;  %v1095_v34 = vld [vmem:[%s6072_s4 + $0x18] sm:$0xff] }
  0x69   :  { %1030 = vmatpush.bf16.msrb.mxu1 %v3157_v37  ;;  %v1094_v37 = vld [vmem:[%s6072_s4 + $0x10] sm:$0xff] }
  0x6c   :  { %1010 = vmatpush.bf16.msrb.mxu0 %v3101_v40 }
  0x6d   :  { %1031 = vmatpush.bf16.msrb.mxu1 %v3149_v43 }
  0x70   :  { %1011 = vmatpush.bf16.msrb.mxu0 %v3093_v49 }
  0x71   :  { %1032 = vmatpush.bf16.msrb.mxu1 %v3141_v57 }
  0x73   :  { %945 = vmatmul.bf16.gmra.mxu0 %v4356_v50 }
  0x74   :  { %1012 = vmatpush.bf16.msrb.mxu0 %v3085_v60  ;;  %964 = vmatmul.bf16.gmra.mxu1 %v4358_v51 }
  0x75   :  { %1033 = vmatpush.bf16.msrb.mxu1 %v3133_v1  ;;  %983 = vmatmul.bf16.gmra.mxu2 %v4366_v56 }
  0x76   :  { %1002 = vmatmul.bf16.gmra.mxu3 %v4602_v47 }
  0x78   :  { %1013 = vmatpush.bf16.msrb.mxu0 %v3077_v4 }
  0x79   :  { %1034 = vmatpush.bf16.msrb.mxu1 %v3125_v7 }
  0x7c   :  { %1014 = vmatpush.bf16.msrb.mxu0 %v3069_v8 }
  0x80   :  { %1015 = vmatpush.bf16.msrb.mxu0 %v3061_v11 }
  0x83   :  { %1016 = vmatmul.bf16.vlgmr.msrb.gmra.mxu0 %v4488_v58 }
  0x84   :  { %3168 = vmatmul.msk.bf16.vlgmr.msrb.gmra.mxu1 %vm773_vm0, %v4490_v59  ;;  %v1107_v59 = vld [vmem:[%s6072_s4 + $0x78] sm:$0xff] }
  0x85   :  { %1124 = vmatpush.msrb.mxu2 %v1107_v59  ;;  %1165 = vmatpush.msra.mxu0 %v1107_v59 }
  0x93   :  { %1021 = vmatmul.bf16.gmra.mxu0 %v4613_v61 }
  0x94   :  { %3169 = vmatmul.msk.bf16.gmra.mxu1 %vm773_vm0, %v4615_v62  ;;  %v1106_v62 = vld [vmem:[%s6072_s4 + $0x70] sm:$0xff] }
  0x95   :  { %1125 = vmatpush.msrb.mxu2 %v1106_v62  ;;  %1166 = vmatpush.msra.mxu0 %v1106_v62 }
  0x97   :  { %1126 = vmatpush.msrb.mxu2 %v1105_v48  ;;  %1167 = vmatpush.msra.mxu0 %v1105_v48 }
  0x99   :  { %1127 = vmatpush.msrb.mxu2 %v1104_v16  ;;  %1168 = vmatpush.msra.mxu0 %v1104_v16 }
  0x9b   :  { %1128 = vmatpush.msrb.mxu2 %v1103_v18  ;;  %1169 = vmatpush.msra.mxu0 %v1103_v18 }
  0x9d   :  { %1129 = vmatpush.msrb.mxu2 %v1102_v21  ;;  %1170 = vmatpush.msra.mxu0 %v1102_v21 }
  0x9f   :  { %1130 = vmatpush.msrb.mxu2 %v1101_v22  ;;  %1171 = vmatpush.msra.mxu0 %v1101_v22 }
  0xa0   :  { %v4768_v50 = vpop.f32.mrf.mxu0 }
  0xa1   :  { %v4770_v51 = vpop.f32.mrf.mxu1  ;;  %1131 = vmatpush.msrb.mxu2 %v1100_v23  ;;  %1172 = vmatpush.msra.mxu0 %v1100_v23 }
  0xa2   :  { %v809_v39 = vadd.f32 %v4770_v51, %v4768_v50 }
  0xa3   :  { %1132 = vmatpush.msrb.mxu2 %v1099_v26  ;;  %1173 = vmatpush.msra.mxu0 %v1099_v26 }
  0xa5   :  { %1133 = vmatpush.msrb.mxu2 %v1098_v28  ;;  %1174 = vmatpush.msra.mxu0 %v1098_v28 }
  0xa7   :  { %1134 = vmatpush.msrb.mxu2 %v1097_v30  ;;  %1175 = vmatpush.msra.mxu0 %v1097_v30 }
  0xa8   :  { %v4772_v56 = vpop.f32.mrf.mxu2  ;;  %v791_v47 = vpop.f32.mrf.mxu0 }
  0xa9   :  { %v4774_v12 = vpop.f32.mrf.mxu3  ;;  %v810_v13 = vpop.f32.mrf.mxu1  ;;  %1135 = vmatpush.msrb.mxu2 %v1096_v31  ;;  %1176 = vmatpush.msra.mxu0 %v1096_v31  ;;  %v828_v42 = vadd.f32 %v4772_v56, %v809_v39  ;;  %v1121_v39 = vld [vmem:[%s6072_s4 + $0xe8] sm:$0xff] }
  0xaa   :  { %v811_v36 = vadd.f32 %v810_v13, %v791_v47 }
  0xab   :  { %1136 = vmatpush.msrb.mxu2 %v1095_v34  ;;  %1177 = vmatpush.msra.mxu0 %v1095_v34  ;;  %v847_v55 = vadd.f32 %v4774_v12, %v828_v42  ;;  %v1120_v42 = vld [vmem:[%s6072_s4 + $0xe0] sm:$0xff] }
  0xad   :  { %1137 = vmatpush.msrb.mxu2 %v1094_v37  ;;  %1178 = vmatpush.msra.mxu0 %v1094_v37 }
  0xaf   :  { %1138 = vmatpush.msrb.mxu2 %v1093_v38  ;;  %1179 = vmatpush.msra.mxu0 %v1093_v38 }
  0xb0   :  { %v829_v14 = vpop.f32.mrf.mxu2  ;;  %v794_v58 = vpop.f32.mrf.mxu0 }
  0xb1   :  { %v4776_v15 = vpop.f32.mrf.mxu3  ;;  %v813_v61 = vpop.f32.mrf.mxu1  ;;  %v830_v40 = vadd.f32 %v829_v14, %v811_v36  ;;  %1139 = vmatpush.msrb.mxu2 %v1092_v53  ;;  %1180 = vmatpush.msra.mxu0 %v1092_v53  ;;  %v1122_v36 = vld [vmem:[%s6072_s4 + $0xf0] sm:$0xff] }
  0xb2   :  { %v814_v41 = vadd.f32 %v813_v61, %v794_v58 }
  0xb3   :  { %v849_v52 = vadd.f32 %v4776_v15, %v830_v40 }
  0xb8   :  { %v832_v44 = vpop.f32.mrf.mxu2  ;;  %v796_v17 = vpop.f32.mrf.mxu0 }
  0xb9   :  { %v815_v19 = vpop.f32.mrf.mxu1  ;;  %v851_v20 = vpop.f32.mrf.mxu3  ;;  %v833_v43 = vadd.f32 %v832_v44, %v814_v41 }
  0xba   :  { %v816_v46 = vadd.f32 %v815_v19, %v796_v17 }
  0xbb   :  { %v852_v60 = vadd.f32 %v851_v20, %v833_v43  ;;  %v1119_v43 = vld [vmem:[%s6072_s4 + $0xd8] sm:$0xff] }
  0xc0   :  { %v834_v24 = vpop.f32.mrf.mxu2  ;;  %v865_v25 = vpop.f32.mrf.mxu0 }
  0xc1   :  { %v884_v27 = vpop.f32.mrf.mxu1  ;;  %v853_v29 = vpop.f32.mrf.mxu3  ;;  %v835_v0 = vadd.f32 %v834_v24, %v816_v46  ;;  %v866_v1 = vadd.f32 %v865_v25, %v847_v55  ;;  %v1116_v55 = vld [vmem:[%s6072_s4 + $0xc0] sm:$0xff] }
  0xc3   :  { %v854_v5 = vadd.f32 %v853_v29, %v835_v0  ;;  %v885_v6 = vadd.f32 %v884_v27, %v866_v1 }
  0xc8   :  { %v903_v32 = vpop.f32.mrf.mxu2  ;;  %v867_v33 = vpop.f32.mrf.mxu0 }
  0xc9   :  { %v886_v35 = vpop.f32.mrf.mxu1  ;;  %v4826_v45 = vpop.f32.mrf.mxu3  ;;  %v868_v63 = vadd.f32 %v867_v33, %v849_v52  ;;  %v4837_v50 = vadd.f32 %v903_v32, %v885_v6  ;;  %v1123_v33 = vld [vmem:[%s6072_s4 + $0xf8] sm:$0xff] }
  0xca   :  { %1144 = vmatpush.msrb.mxu3 %v1123_v33  ;;  %1185 = vmatpush.msra.mxu1 %v1123_v33  ;;  %v1111_v6 = vld [vmem:[%s6072_s4 + $0x98] sm:$0xff] }
  0xcb   :  { %v887_v3 = vadd.f32 %v886_v35, %v868_v63  ;;  %v1066_v12 = vmul.f32 %v4837_v50, %v4837_v50  ;;  %v1114_v63 = vld [vmem:[%s6072_s4 + $0xb0] sm:$0xff] }
  0xcc   :  { %1145 = vmatpush.msrb.mxu3 %v1122_v36  ;;  %1186 = vmatpush.msra.mxu1 %v1122_v36 }
  0xce   :  { %1146 = vmatpush.msrb.mxu3 %v1121_v39  ;;  %1187 = vmatpush.msra.mxu1 %v1121_v39 }
  0xd0   :  { %v905_v49 = vpop.f32.mrf.mxu2  ;;  %v870_v54 = vpop.f32.mrf.mxu0  ;;  %1147 = vmatpush.msrb.mxu3 %v1120_v42  ;;  %1188 = vmatpush.msra.mxu1 %v1120_v42 }
  0xd1   :  { %v889_v57 = vpop.f32.mrf.mxu1  ;;  %v871_v2 = vadd.f32 %v870_v54, %v852_v60  ;;  %v4833_v7 = vadd.f32 %v905_v49, %v887_v3  ;;  %v4835_v9 = vpop.f32.mrf.mxu3  ;;  %v1118_v49 = vld [vmem:[%s6072_s4 + $0xd0] sm:$0xff]  ;;  %v1117_v54 = vld [vmem:[%s6072_s4 + $0xc8] sm:$0xff]  ;;  %v1115_v60 = vld [vmem:[%s6072_s4 + $0xb8] sm:$0xff] }
  0xd2   :  { %1148 = vmatpush.msrb.mxu3 %v1119_v43  ;;  %1189 = vmatpush.msra.mxu1 %v1119_v43 }
  0xd3   :  { %v890_v8 = vadd.f32 %v889_v57, %v871_v2  ;;  %v1068_v47 = vmul.f32 %v4833_v7, %v4833_v7  ;;  %v1048_v13 = vadd.f32 %v4833_v7, %v4837_v50  ;;  %v1113_v2 = vld [vmem:[%s6072_s4 + $0xa8] sm:$0xff] }
  0xd4   :  { %1149 = vmatpush.msrb.mxu3 %v1118_v49  ;;  %1190 = vmatpush.msra.mxu1 %v1118_v49 }
  0xd5   :  { %v1074_v59 = vadd.f32 %v1068_v47, %v1066_v12 }
  0xd6   :  { %1150 = vmatpush.msrb.mxu3 %v1117_v54  ;;  %1191 = vmatpush.msra.mxu1 %v1117_v54 }
  0xd8   :  { %v908_v4 = vpop.f32.mrf.mxu2  ;;  %v872_v10 = vpop.f32.mrf.mxu0  ;;  %1151 = vmatpush.msrb.mxu3 %v1116_v55  ;;  %1192 = vmatpush.msra.mxu1 %v1116_v55 }
  0xd9   :  { %v891_v11 = vpop.f32.mrf.mxu1  ;;  %v4839_v51 = vadd.f32 %v908_v4, %v890_v8  ;;  %v873_v56 = vadd.f32 %v872_v10, %v854_v5  ;;  %v4856_v17 = vpop.f32.mrf.mxu3  ;;  %v1112_v4 = vld [vmem:[%s6072_s4 + $0xa0] sm:$0xff] }
  0xda   :  { %1152 = vmatpush.msrb.mxu3 %v1115_v60  ;;  %1193 = vmatpush.msra.mxu1 %v1115_v60 }
  0xdb   :  { %v1070_v14 = vmul.f32 %v4839_v51, %v4839_v51  ;;  %v892_v58 = vadd.f32 %v891_v11, %v873_v56  ;;  %v1049_v61 = vadd.f32 %v1048_v13, %v4839_v51  ;;  %v1110_v11 = vld [vmem:[%s6072_s4 + $0x90] sm:$0xff] }
  0xdc   :  { %1153 = vmatpush.msrb.mxu3 %v1114_v63  ;;  %1194 = vmatpush.msra.mxu1 %v1114_v63 }
  0xdd   :  { %v1075_v44 = vadd.f32 %v1074_v59, %v1070_v14 }
  0xde   :  { %1154 = vmatpush.msrb.mxu3 %v1113_v2  ;;  %1195 = vmatpush.msra.mxu1 %v1113_v2 }
  0xe0   :  { %v910_v15 = vpop.f32.mrf.mxu2  ;;  %v4852_v48 = vpop.f32.mrf.mxu0  ;;  %1155 = vmatpush.msrb.mxu3 %v1112_v4  ;;  %1196 = vmatpush.msra.mxu1 %v1112_v4 }
  0xe1   :  { %v4850_v62 = vadd.f32 %v910_v15, %v892_v58  ;;  %v4854_v16 = vpop.f32.mrf.mxu1  ;;  %v4863_v30 = vpop.f32.mrf.mxu3  ;;  %v942_v8 = vadd.f32 %v4852_v48, %v4826_v45  ;;  %v1108_v45 = vld [vmem:[%s6072_s4 + $0x80] sm:$0xff] }
  0xe2   :  { %1156 = vmatpush.msrb.mxu3 %v1111_v6  ;;  %1197 = vmatpush.msra.mxu1 %v1111_v6  ;;  %v1225_v6 = vld [vmem:[%s6073_s5 + $0x18] sm:$0xff] }
  0xe3   :  { %v1050_v18 = vadd.f32 %v1049_v61, %v4850_v62  ;;  %v1072_v19 = vmul.f32 %v4850_v62, %v4850_v62  ;;  %v961_v13 = vadd.f32 %v4854_v16, %v942_v8 }
  0xe4   :  { %1157 = vmatpush.msrb.mxu3 %v1110_v11  ;;  %1198 = vmatpush.msra.mxu1 %v1110_v11  ;;  %v1223_v11 = vld [vmem:[%s6073_s5 + $0x8] sm:$0xff] }
  0xe5   :  { %v1051_v20 = vrot.slane %v1050_v18, 4  ;;  %v1076_v21 = vadd.f32 %v1075_v44, %v1072_v19 }
  0xe7   :  { %v1052_v22 = vadd.f32 %v1051_v20, %v1050_v18  ;;  %v1077_v23 = vrot.slane %v1076_v21, 4 }
  0xe8   :  { %v943_v26 = vpop.f32.mrf.mxu0  ;;  %v979_v41 = vpop.f32.mrf.mxu2 }
  0xe9   :  { %v1053_v24 = vrot.slane %v1052_v22, 2  ;;  %v1078_v25 = vadd.f32 %v1077_v23, %v1076_v21  ;;  %v4861_v27 = vpop.f32.mrf.mxu1  ;;  %v998_v53 = vpop.f32.mrf.mxu3  ;;  %v944_v5 = vadd.f32 %v943_v26, %v4835_v9  ;;  %v1109_v9 = vld [vmem:[%s6072_s4 + $0x88] sm:$0xff]  ;;  %v980_v61 = vadd.f32 %v979_v41, %v961_v13 }
  0xea   :  { %1158 = vmatpush.msrb.mxu3 %v1109_v9  ;;  %1199 = vmatpush.msra.mxu1 %v1109_v9 }
  0xeb   :  { %v1054_v28 = vadd.f32 %v1053_v24, %v1052_v22  ;;  %v1079_v29 = vrot.slane %v1078_v25, 2  ;;  %v963_v47 = vadd.f32 %v4861_v27, %v944_v5  ;;  %v999_v18 = vadd.f32 %v998_v53, %v980_v61  ;;  %v1224_v5 = vld [vmem:[%s6073_s5 + $0x10] sm:$0xff]  ;;  %v3234_v61 = vld [vmem:[%s6074_s2 + $0x78] sm:$0xf0] }
  0xec   :  { %1159 = vmatpush.msrb.mxu3 %v1108_v45  ;;  %1200 = vmatpush.msra.mxu1 %v1108_v45 }
  0xed   :  { %v1055_v31 = vrot.slane %v1054_v28, 1  ;;  %v1080_v32 = vadd.f32 %v1079_v29, %v1078_v25  ;;  %1244 = vmatpush.msra.mxu2 %v1224_v5 }
  0xee   :  { %1264 = vmatpush.msra.mxu3 %v1225_v6 }
  0xef   :  { %v1056_v34 = vadd.f32 %v1055_v31, %v1054_v28  ;;  %v1081_v35 = vrot.slane %v1080_v32, 1 }
  0xf0   :  { %v946_v37 = vpop.f32.mrf.mxu0  ;;  %v981_v46 = vpop.f32.mrf.mxu2  ;;  %1265 = vmatpush.msra.mxu3 %v1223_v11 }
  0xf1   :  { %1140 = vmatmul.f32.vlgmr.msrb.gmra.mxu2 %v1056_v34  ;;  %v1082_v38 = vadd.f32 %v1081_v35, %v1080_v32  ;;  %v965_v40 = vpop.f32.mrf.mxu1  ;;  %v1000_v0 = vpop.f32.mrf.mxu3  ;;  %v947_v10 = vadd.f32 %v946_v37, %v4856_v17  ;;  %v982_v14 = vadd.f32 %v981_v46, %v963_v47 }
  0xf3   :  { %1181 = vmatmul.f32.vlgmr.msra.gmra.mxu0 %v1082_v38  ;;  %v966_v58 = vadd.f32 %v965_v40, %v947_v10  ;;  %v1001_v44 = vadd.f32 %v1000_v0, %v982_v14  ;;  %v1222_v10 = vld [vmem:[%s6073_s5] sm:$0xff] }
  0xf4   :  { %1245 = vmatpush.msra.mxu2 %v1222_v10 }
  0xf6   :  { %1287 = vmatpush.msrb.mxu2 %v1224_v5  ;;  %v3288_v5 = vld [vmem:[%s6074_s2 + $0xe0] sm:$0xf] }
  0xf8   :  { %v948_v52 = vpop.f32.mrf.mxu0  ;;  %v984_v56 = vpop.f32.mrf.mxu2  ;;  %1288 = vmatpush.msrb.mxu2 %v1222_v10 }
  0xf9   :  { %v967_v57 = vpop.f32.mrf.mxu1  ;;  %v1003_v59 = vpop.f32.mrf.mxu3  ;;  %v985_v48 = vadd.f32 %v984_v56, %v966_v58  ;;  %v949_v17 = vadd.f32 %v948_v52, %v4863_v30 }
  0xfb   :  { %v1004_v19 = vadd.f32 %v1003_v59, %v985_v48  ;;  %v968_v23 = vadd.f32 %v967_v57, %v949_v17  ;;  %v3794_v59 = vld [vmem:[%s6074_s2 + $0x74] sm:$0xf] }
  0xfc   :  { %v3810_v17 = vld [vmem:[%s6074_s2 + $0xf4] sm:$0xf] }
 0x100   :  { %v1017_v1 = vpop.f32.mrf.mxu0  ;;  %v986_v21 = vpop.f32.mrf.mxu2 }
 0x101   :  { %v1036_v3 = vpop.f32.mrf.mxu1  ;;  %v1018_v16 = vadd.f32 %v1017_v1, %v999_v18  ;;  %v987_v26 = vadd.f32 %v986_v21, %v968_v23  ;;  %v1005_v28 = vpop.f32.mrf.mxu3  ;;  %v3298_v18 = vld [vmem:[%s6074_s2 + $0xf8] sm:$0xf0]  ;;  %v3226_v21 = vld [vmem:[%s6074_s2 + $0x68] sm:$0xf0]  ;;  %v3808_v23 = vld [vmem:[%s6074_s2 + $0xe4] sm:$0xf] }
 0x103   :  { %v4922_v29 = vadd.f32 %v1036_v3, %v1018_v16  ;;  %v1006_v32 = vadd.f32 %v1005_v28, %v987_v26  ;;  %v3290_v16 = vld [vmem:[%s6074_s2 + $0xe8] sm:$0xf0]  ;;  %v3218_v26 = vld [vmem:[%s6074_s2 + $0x58] sm:$0xf0]  ;;  %v3806_v28 = vld [vmem:[%s6074_s2 + $0xd4] sm:$0xf] }
 0x105   :  { %v1067_v34 = vmul.f32 %v4922_v29, %v4922_v29 }
 0x108   :  { %v1019_v12 = vpop.f32.mrf.mxu0 }
 0x109   :  { %v1038_v15 = vpop.f32.mrf.mxu1  ;;  %v1020_v20 = vadd.f32 %v1019_v12, %v1001_v44  ;;  %v3237_v44 = vor.u32 %v3794_v59, %v3234_v61  ;;  %v3789_v59 = vld [vmem:[%s6074_s2 + $0x44] sm:$0xf0]  ;;  %v3272_v61 = vld [vmem:[%s6074_s2 + $0xc0] sm:$0xf] }
 0x10b   :  { %v4920_v27 = vadd.f32 %v1038_v15, %v1020_v20  ;;  %1591 = vmatpush.bf16.msrb.mxu0 %v3237_v44  ;;  %v3792_v20 = vld [vmem:[%s6074_s2 + $0x64] sm:$0xf] }
 0x10d   :  { %v1069_v30 = vmul.f32 %v4920_v27, %v4920_v27  ;;  %v1057_v35 = vadd.f32 %v4920_v27, %v4922_v29 }
 0x10f   :  { %v1083_v39 = vadd.f32 %v1069_v30, %v1067_v34  ;;  %v3282_v30 = vld [vmem:[%s6074_s2 + $0xd8] sm:$0xf0]  ;;  %v3788_v34 = vld [vmem:[%s6074_s2 + $0x44] sm:$0xf] }
 0x110   :  { %v1022_v22 = vpop.f32.mrf.mxu0 }
 0x111   :  { %v1023_v24 = vadd.f32 %v1022_v22, %v1004_v19  ;;  %v1041_v25 = vpop.f32.mrf.mxu1  ;;  %v3301_v19 = vor.u32 %v3810_v17, %v3298_v18  ;;  %v3229_v22 = vor.u32 %v3792_v20, %v3226_v21  ;;  %v3200_v18 = vld [vmem:[%s6074_s2 + $0x30] sm:$0xf] }
 0x112   :  { %v3264_v20 = vld [vmem:[%s6074_s2 + $0xb0] sm:$0xf] }
 0x113   :  { %v4924_v31 = vadd.f32 %v1041_v25, %v1023_v24  ;;  %1610 = vmatpush.bf16.msrb.mxu1 %v3301_v19  ;;  %v3293_v24 = vor.u32 %v3808_v23, %v3290_v16  ;;  %v3790_v25 = vld [vmem:[%s6074_s2 + $0x54] sm:$0xf]  ;;  %1592 = vmatpush.bf16.msrb.mxu0 %v3229_v22  ;;  %v3787_v19 = vld [vmem:[%s6074_s2 + $0x34] sm:$0xf0]  ;;  %v3202_v16 = vld [vmem:[%s6074_s2 + $0x38] sm:$0xf0] }
 0x114   :  { %v3201_v21 = vor.u32 %v3787_v19, %v3200_v18  ;;  %v3803_v22 = vld [vmem:[%s6074_s2 + $0xb4] sm:$0xf0]  ;;  %v3786_v23 = vld [vmem:[%s6074_s2 + $0x34] sm:$0xf] }
 0x115   :  { %v1071_v36 = vmul.f32 %v4924_v31, %v4924_v31  ;;  %v1058_v40 = vadd.f32 %v1057_v35, %v4924_v31  ;;  %v3842_v19 = vld [vmem:[%s6074_s2 + $0x1f4] sm:$0xf] }
 0x117   :  { %v1084_v42 = vadd.f32 %v1083_v39, %v1071_v36  ;;  %1611 = vmatpush.bf16.msrb.mxu1 %v3293_v24  ;;  %v3210_v36 = vld [vmem:[%s6074_s2 + $0x48] sm:$0xf0]  ;;  %v3265_v24 = vor.u32 %v3803_v22, %v3264_v20  ;;  %v3458_v20 = vld [vmem:[%s6074_s2 + $0x1f8] sm:$0xf0] }
 0x118   :  { %v1024_v33 = vpop.f32.mrf.mxu0  ;;  %v3461_v22 = vor.u32 %v3842_v19, %v3458_v20 }
 0x119   :  { %v1025_v37 = vadd.f32 %v1024_v33, %v1006_v32  ;;  %v1043_v38 = vpop.f32.mrf.mxu1  ;;  %v3221_v32 = vor.u32 %v3790_v25, %v3218_v26  ;;  %v3285_v33 = vor.u32 %v3806_v28, %v3282_v30  ;;  %v3205_v25 = vor.u32 %v3786_v23, %v3202_v16  ;;  %v3802_v26 = vld [vmem:[%s6074_s2 + $0xb4] sm:$0xf]  ;;  %v3266_v28 = vld [vmem:[%s6074_s2 + $0xb8] sm:$0xf0]  ;;  %v3192_v30 = vld [vmem:[%s6074_s2 + $0x20] sm:$0xf] }
 0x11a   :  { %v3825_v23 = vld [vmem:[%s6074_s2 + $0x164] sm:$0xf0]  ;;  %v3448_v16 = vld [vmem:[%s6074_s2 + $0x1e0] sm:$0xf] }
 0x11b   :  { %v4935_v41 = vadd.f32 %v1043_v38, %v1025_v37  ;;  %v3804_v37 = vld [vmem:[%s6074_s2 + $0xc4] sm:$0xf]  ;;  %v3274_v38 = vld [vmem:[%s6074_s2 + $0xc8] sm:$0xf0]  ;;  %1593 = vmatpush.bf16.msrb.mxu0 %v3221_v32  ;;  %1612 = vmatpush.bf16.msrb.mxu1 %v3285_v33  ;;  %v3269_v32 = vor.u32 %v3802_v26, %v3266_v28  ;;  %v3785_v33 = vld [vmem:[%s6074_s2 + $0x24] sm:$0xf0] }
 0x11c   :  { %v3824_v28 = vld [vmem:[%s6074_s2 + $0x164] sm:$0xf] }
 0x11d   :  { %v1059_v43 = vadd.f32 %v1058_v40, %v4935_v41  ;;  %v1073_v53 = vmul.f32 %v4935_v41, %v4935_v41  ;;  %v3213_v40 = vor.u32 %v3788_v34, %v3210_v36  ;;  %v3256_v34 = vld [vmem:[%s6074_s2 + $0xa0] sm:$0xf]  ;;  %v3801_v36 = vld [vmem:[%s6074_s2 + $0xa4] sm:$0xf0] }
 0x11f   :  { %v1060_v49 = vrot.slane %v1059_v43, 4  ;;  %v1085_v52 = vadd.f32 %v1084_v42, %v1073_v53  ;;  %1594 = vmatpush.bf16.msrb.mxu0 %v3213_v40 }
 0x121   :  { %v1061_v54 = vadd.f32 %v1060_v49, %v1059_v43  ;;  %v1086_v57 = vrot.slane %v1085_v52, 4  ;;  %v3277_v43 = vor.u32 %v3804_v37, %v3274_v38  ;;  %v3784_v37 = vld [vmem:[%s6074_s2 + $0x24] sm:$0xf]  ;;  %v3194_v38 = vld [vmem:[%s6074_s2 + $0x28] sm:$0xf0] }
 0x122   :  { %v3197_v40 = vor.u32 %v3784_v37, %v3194_v38  ;;  %v3440_v38 = vld [vmem:[%s6074_s2 + $0x1d0] sm:$0xf] }
 0x123   :  { %v1062_v55 = vrot.slane %v1061_v54, 2  ;;  %v1087_v46 = vadd.f32 %v1086_v57, %v1085_v52  ;;  %v3232_v52 = vld [vmem:[%s6074_s2 + $0x70] sm:$0xf]  ;;  %1613 = vmatpush.bf16.msrb.mxu1 %v3277_v43  ;;  %1595 = vmatpush.bf16.msrb.mxu0 %v3205_v25  ;;  %v3258_v43 = vld [vmem:[%s6074_s2 + $0xa8] sm:$0xf0] }
 0x124   :  { %v3296_v57 = vld [vmem:[%s6074_s2 + $0xf0] sm:$0xf] }
 0x125   :  { %v1063_v60 = vadd.f32 %v1062_v55, %v1061_v54  ;;  %v1088_v63 = vrot.slane %v1087_v46, 2  ;;  %v3795_v54 = vld [vmem:[%s6074_s2 + $0x74] sm:$0xf0] }
 0x126   :  { %v3811_v55 = vld [vmem:[%s6074_s2 + $0xf4] sm:$0xf0] }
 0x127   :  { %v1064_v0 = vrot.slane %v1063_v60, 1  ;;  %v1089_v1 = vadd.f32 %v1088_v63, %v1087_v46  ;;  %v1046_v46 = vld [vmem:[%s6075_s6] sm:$0x1]  ;;  %1614 = vmatpush.bf16.msrb.mxu1 %v3269_v32  ;;  %1596 = vmatpush.bf16.msrb.mxu0 %v3197_v40  ;;  %v3386_v32 = vld [vmem:[%s6074_s2 + $0x168] sm:$0xf0] }
 0x128   :  { %v3822_v40 = vld [vmem:[%s6074_s2 + $0x154] sm:$0xf] }
 0x129   :  { %v1065_v2 = vadd.f32 %v1064_v0, %v1063_v60  ;;  %v1090_v3 = vrot.slane %v1089_v1, 1  ;;  %v3233_v0 = vor.u32 %v3795_v54, %v3232_v52  ;;  %v3783_v52 = vld [vmem:[%s6074_s2 + $0x14] sm:$0xf0]  ;;  %v3248_v54 = vld [vmem:[%s6074_s2 + $0x90] sm:$0xf] }
 0x12b   :  { %1160 = vmatmul.f32.vlgmr.msrb.gmra.mxu3 %v1065_v2  ;;  %v1091_v4 = vadd.f32 %v1090_v3, %v1089_v1  ;;  %v3297_v1 = vor.u32 %v3811_v55, %v3296_v57  ;;  %v3224_v2 = vld [vmem:[%s6074_s2 + $0x60] sm:$0xf]  ;;  %v3799_v55 = vld [vmem:[%s6074_s2 + $0x94] sm:$0xf0] }
 0x12c   :  { %1307 = vmatpush.msrb.mxu3 %v1225_v6  ;;  %v3809_v6 = vld [vmem:[%s6074_s2 + $0xe4] sm:$0xf0] }
 0x12d   :  { %1201 = vmatmul.f32.vlgmr.msra.gmra.mxu1 %v1091_v4  ;;  %v3793_v4 = vld [vmem:[%s6074_s2 + $0x64] sm:$0xf0]  ;;  %v3289_v10 = vor.u32 %v3809_v6, %v3288_v5  ;;  %v3240_v6 = vld [vmem:[%s6074_s2 + $0x80] sm:$0xf] }
 0x12e   :  { %1308 = vmatpush.msrb.mxu3 %v1223_v11  ;;  %v3216_v11 = vld [vmem:[%s6074_s2 + $0x50] sm:$0xf]  ;;  %v3781_v5 = vld [vmem:[%s6074_s2 + $0x4] sm:$0xf0] }
 0x170   :  { %v1182_v56 = vpop.f32.mrf.mxu0 }
 0x174   :  { %v1141_v9 = vpop.f32.mrf.mxu2 }
 0x1aa   :  { %v1202_v8 = vpop.f32.mrf.mxu1 }
 0x1ab   :  { %v1203_v12 = vadd.f32 %v1202_v8, %v1182_v56  ;;  %v3225_v8 = vor.u32 %v3793_v4, %v3224_v2  ;;  %v3250_v2 = vld [vmem:[%s6074_s2 + $0x98] sm:$0xf0]  ;;  %v3176_v4 = vld [vmem:[%s6074_s2] sm:$0xf] }
 0x1ad   :  { %v1205_v14 = vmul.f32 0.001953125, %v1203_v12  ;;  %v3807_v12 = vld [vmem:[%s6074_s2 + $0xd4] sm:$0xf0] }
 0x1ae   :  { %v1161_v47 = vpop.f32.mrf.mxu3 }
 0x1af   :  { %v1162_v45 = vadd.f32 %v1161_v47, %v1141_v9  ;;  %v3791_v9 = vld [vmem:[%s6074_s2 + $0x54] sm:$0xf0]  ;;  %v3280_v47 = vld [vmem:[%s6074_s2 + $0xd0] sm:$0xf] }
 0x1b1   :  { %v4952_v13 = vmul.f32 0.001953125, %v1162_v45  ;;  %v1047_v45 = vld [vmem:[%s6076_s7] sm:$0x1] }
 0x1b3   :  { %v1206_v58 = vmul.f32 %v4952_v13, %v4952_v13 }
 0x1b5   :  { %v1207_v15 = vsub.f32 %v1205_v14, %v1206_v58  ;;  %v3217_v14 = vor.u32 %v3791_v9, %v3216_v11  ;;  %v3208_v58 = vld [vmem:[%s6074_s2 + $0x40] sm:$0xf]  ;;  %v3780_v11 = vld [vmem:[%s6074_s2 + $0x4] sm:$0xf] }
 0x1b6   :  { %v3209_v44 = vor.u32 %v3789_v59, %v3208_v58  ;;  %v3827_v58 = vld [vmem:[%s6074_s2 + $0x174] sm:$0xf0] }
 0x1b7   :  { %v1208_v48 = vadd.f32 1e-05, %v1207_v15 }
 0x1b9   :  { %3876 = vrsqrt.f32 %v1208_v48  ;;  %vm1215_vm2 = vweird.f32 %v1208_v48 }
 0x1bf   :  { %v3877_v35 = vpop.eup %3876 }
 0x1c0   :  { %v1210_v39 = vmul.f32 %v3877_v35, %v1208_v48  ;;  %vm1216_vm1 = vweird.f32 %v3877_v35  ;;  %v3805_v48 = vld [vmem:[%s6074_s2 + $0xc4] sm:$0xf0] }
 0x1c1   :  { %vm1217_vm3 = vmor %vm1215_vm2, %vm1216_vm1  ;;  %v3273_v17 = vor.u32 %v3805_v48, %v3272_v61  ;;  %v3843_v61 = vld [vmem:[%s6074_s2 + $0x1f4] sm:$0xf0]  ;;  %v3826_v48 = vld [vmem:[%s6074_s2 + $0x174] sm:$0xf] }
 0x1c2   :  { %v1211_v42 = vmul.f32 %v3877_v35, %v1210_v39  ;;  %v3257_v39 = vor.u32 %v3801_v36, %v3256_v34  ;;  %v3450_v34 = vld [vmem:[%s6074_s2 + $0x1e8] sm:$0xf0]  ;;  %v3823_v36 = vld [vmem:[%s6074_s2 + $0x154] sm:$0xf0] }
 0x1c4   :  { %v1212_v53 = vmul.f32 0.5, %v1211_v42  ;;  %v3800_v42 = vld [vmem:[%s6074_s2 + $0xa4] sm:$0xf] }
 0x1c6   :  { %v1213_v49 = vsub.f32 1.5, %v1212_v53  ;;  %v3261_v53 = vor.u32 %v3800_v42, %v3258_v43  ;;  %v3378_v43 = vld [vmem:[%s6074_s2 + $0x158] sm:$0xf0] }
 0x1c8   :  { %v1214_v60 = vmul.f32 %v3877_v35, %v1213_v49  ;;  %1615 = vmatpush.bf16.msrb.mxu1 %v3261_v53  ;;  %v3184_v49 = vld [vmem:[%s6074_s2 + $0x10] sm:$0xf]  ;;  %v3838_v53 = vld [vmem:[%s6074_s2 + $0x1d4] sm:$0xf] }
 0x1c9   :  { %v3185_v57 = vor.u32 %v3783_v52, %v3184_v49  ;;  %v3442_v49 = vld [vmem:[%s6074_s2 + $0x1d8] sm:$0xf0] }
 0x1ca   :  { %v1218_v63 = vsel %vm1217_vm3, %v3877_v35, %v1214_v60  ;;  %v3193_v35 = vor.u32 %v3785_v33, %v3192_v30  ;;  %v3186_v60 = vld [vmem:[%s6074_s2 + $0x18] sm:$0xf0]  ;;  %v3840_v30 = vld [vmem:[%s6074_s2 + $0x1e4] sm:$0xf]  ;;  %v3389_v33 = vor.u32 %v3824_v28, %v3386_v32  ;;  %v3354_v32 = vld [vmem:[%s6074_s2 + $0x128] sm:$0xf0] }
 0x1cb   :  { %v1219_v3 = vmul.f32 %v1218_v63, %v1046_v46  ;;  %v3782_v46 = vld [vmem:[%s6074_s2 + $0x14] sm:$0xf]  ;;  %v3249_v63 = vor.u32 %v3799_v55, %v3248_v54  ;;  %v3453_v37 = vor.u32 %v3840_v30, %v3450_v34  ;;  %v3381_v54 = vor.u32 %v3822_v40, %v3378_v43  ;;  %v3821_v55 = vld [vmem:[%s6074_s2 + $0x144] sm:$0xf0]  ;;  %v3816_v28 = vld [vmem:[%s6074_s2 + $0x124] sm:$0xf] }
 0x1cc   :  { %v3357_v34 = vor.u32 %v3816_v28, %v3354_v32  ;;  %v3815_v40 = vld [vmem:[%s6074_s2 + $0x114] sm:$0xf0] }
 0x1cd   :  { %3170 = vmatmul.msk.f32.vlgmr.msra.gmra.mxu2 %vm1226_vm4, %v1219_v3  ;;  %3171 = vmatmul.msk.f32.vlgmr.msra.gmra.mxu3 %vm1226_vm4, %v1219_v3  ;;  %v1220_v56 = vmul.f32 %v1219_v3, %v4952_v13  ;;  %v3281_v13 = vor.u32 %v3807_v12, %v3280_v47  ;;  %v3796_v12 = vld [vmem:[%s6074_s2 + $0x84] sm:$0xf] }
 0x1ce   :  { %1553 = vmatpush.bf16.msra.mxu2 %v3233_v0  ;;  %1572 = vmatpush.bf16.msra.mxu3 %v3297_v1  ;;  %v3189_v0 = vor.u32 %v3782_v46, %v3186_v60  ;;  %v3798_v1 = vld [vmem:[%s6074_s2 + $0x94] sm:$0xf]  ;;  %v3432_v46 = vld [vmem:[%s6074_s2 + $0x1c0] sm:$0xf]  ;;  %v3445_v60 = vor.u32 %v3838_v53, %v3442_v49  ;;  %v3408_v49 = vld [vmem:[%s6074_s2 + $0x190] sm:$0xf] }
 0x1cf   :  { %v1221_v15 = vsub.f32 %v1047_v45, %v1220_v56  ;;  %v3253_v3 = vor.u32 %v3798_v1, %v3250_v2  ;;  %v3178_v56 = vld [vmem:[%s6074_s2 + $0x8] sm:$0xf0]  ;;  %v3836_v2 = vld [vmem:[%s6074_s2 + $0x1c4] sm:$0xf] }
 0x1d0   :  { %1597 = vmatpush.bf16.msrb.mxu0 %v3189_v0  ;;  %v3181_v47 = vor.u32 %v3780_v11, %v3178_v56  ;;  %v3242_v45 = vld [vmem:[%s6074_s2 + $0x88] sm:$0xf0]  ;;  %v3820_v0 = vld [vmem:[%s6074_s2 + $0x144] sm:$0xf] }
 0x1d1   :  { %1616 = vmatpush.bf16.msrb.mxu1 %v3253_v3  ;;  %v3370_v1 = vld [vmem:[%s6074_s2 + $0x148] sm:$0xf0] }
 0x1d2   :  { %1554 = vmatpush.bf16.msra.mxu2 %v3225_v8  ;;  %1573 = vmatpush.bf16.msra.mxu3 %v3289_v10  ;;  %v3177_v8 = vor.u32 %v3781_v5, %v3176_v4  ;;  %v3797_v10 = vld [vmem:[%s6074_s2 + $0x84] sm:$0xf0]  ;;  %v3434_v3 = vld [vmem:[%s6074_s2 + $0x1c8] sm:$0xf0] }
 0x1d3   :  { %v3241_v9 = vor.u32 %v3797_v10, %v3240_v6  ;;  %v3373_v10 = vor.u32 %v3820_v0, %v3370_v1  ;;  %v3437_v11 = vor.u32 %v3836_v2, %v3434_v3  ;;  %v3336_v3 = vld [vmem:[%s6074_s2 + $0x100] sm:$0xf] }
 0x1d4   :  { %1598 = vmatpush.bf16.msrb.mxu0 %v3181_v47  ;;  %v3360_v47 = vld [vmem:[%s6074_s2 + $0x130] sm:$0xf] }
 0x1d5   :  { %3172 = vmatmul.msk.f32.vlgmr.msrb.gmra.mxu2 %vm1226_vm4, %v1221_v15  ;;  %3173 = vmatmul.msk.f32.vlgmr.msrb.gmra.mxu3 %vm1226_vm4, %v1221_v15  ;;  %v3456_v15 = vld [vmem:[%s6074_s2 + $0x1f0] sm:$0xf] }
 0x1d6   :  { %1555 = vmatpush.bf16.msra.mxu2 %v3217_v14  ;;  %1574 = vmatpush.bf16.msra.mxu3 %v3281_v13  ;;  %v3245_v14 = vor.u32 %v3796_v12, %v3242_v45  ;;  %v3392_v13 = vld [vmem:[%s6074_s2 + $0x170] sm:$0xf]  ;;  %v3819_v12 = vld [vmem:[%s6074_s2 + $0x134] sm:$0xf0] }
 0x1d7   :  { %v3393_v59 = vor.u32 %v3827_v58, %v3392_v13  ;;  %v3424_v45 = vld [vmem:[%s6074_s2 + $0x1b0] sm:$0xf]  ;;  %v3835_v13 = vld [vmem:[%s6074_s2 + $0x1b4] sm:$0xf0]  ;;  %v3818_v58 = vld [vmem:[%s6074_s2 + $0x134] sm:$0xf] }
 0x1d8   :  { %1617 = vmatpush.bf16.msrb.mxu1 %v3245_v14  ;;  %v3361_v14 = vor.u32 %v3819_v12, %v3360_v47  ;;  %v3812_v12 = vld [vmem:[%s6074_s2 + $0x104] sm:$0xf] }
 0x1da   :  { %1556 = vmatpush.bf16.msra.mxu2 %v3209_v44  ;;  %1575 = vmatpush.bf16.msra.mxu3 %v3273_v17  ;;  %v3394_v44 = vld [vmem:[%s6074_s2 + $0x178] sm:$0xf0]  ;;  %v3457_v17 = vor.u32 %v3843_v61, %v3456_v15 }
 0x1db   :  { %v3397_v18 = vor.u32 %v3826_v48, %v3394_v44  ;;  %v3362_v15 = vld [vmem:[%s6074_s2 + $0x138] sm:$0xf0]  ;;  %v3834_v48 = vld [vmem:[%s6074_s2 + $0x1b4] sm:$0xf] }
 0x1dc   :  { %1883 = vmatpush.bf16.msra.mxu1 %v3461_v22  ;;  %v3365_v61 = vor.u32 %v3818_v58, %v3362_v15  ;;  %v3426_v44 = vld [vmem:[%s6074_s2 + $0x1b8] sm:$0xf0]  ;;  %v3338_v15 = vld [vmem:[%s6074_s2 + $0x108] sm:$0xf0] }
 0x1dd   :  { %1864 = vmatpush.bf16.msra.mxu0 %v3397_v18  ;;  %v3429_v22 = vor.u32 %v3834_v48, %v3426_v44 }
 0x1de   :  { %1557 = vmatpush.bf16.msra.mxu2 %v3201_v21  ;;  %1576 = vmatpush.bf16.msra.mxu3 %v3265_v24  ;;  %v3384_v21 = vld [vmem:[%s6074_s2 + $0x160] sm:$0xf]  ;;  %v3841_v24 = vld [vmem:[%s6074_s2 + $0x1e4] sm:$0xf0] }
 0x1df   :  { %v3385_v25 = vor.u32 %v3825_v23, %v3384_v21  ;;  %v3449_v26 = vor.u32 %v3841_v24, %v3448_v16  ;;  %v3817_v23 = vld [vmem:[%s6074_s2 + $0x124] sm:$0xf0]  ;;  %v3416_v16 = vld [vmem:[%s6074_s2 + $0x1a0] sm:$0xf] }
 0x1e0   :  { %1884 = vmatpush.bf16.msra.mxu1 %v3453_v37  ;;  %v3833_v24 = vld [vmem:[%s6074_s2 + $0x1a4] sm:$0xf0]  ;;  %v3832_v37 = vld [vmem:[%s6074_s2 + $0x1a4] sm:$0xf] }
 0x1e1   :  { %1865 = vmatpush.bf16.msra.mxu0 %v3389_v33 }
 0x1e2   :  { %1558 = vmatpush.bf16.msra.mxu2 %v3193_v35  ;;  %1577 = vmatpush.bf16.msra.mxu3 %v3257_v39  ;;  %v3376_v35 = vld [vmem:[%s6074_s2 + $0x150] sm:$0xf]  ;;  %v3839_v39 = vld [vmem:[%s6074_s2 + $0x1d4] sm:$0xf0] }
 0x1e3   :  { %v3377_v42 = vor.u32 %v3823_v36, %v3376_v35  ;;  %v3441_v52 = vor.u32 %v3839_v39, %v3440_v38  ;;  %v3418_v38 = vld [vmem:[%s6074_s2 + $0x1a8] sm:$0xf0] }
 0x1e4   :  { %1885 = vmatpush.bf16.msra.mxu1 %v3445_v60  ;;  %v3421_v53 = vor.u32 %v3832_v37, %v3418_v38  ;;  %v3830_v60 = vld [vmem:[%s6074_s2 + $0x194] sm:$0xf] }
 0x1e5   :  { %1866 = vmatpush.bf16.msra.mxu0 %v3381_v54  ;;  %v3814_v54 = vld [vmem:[%s6074_s2 + $0x114] sm:$0xf] }
 0x1e6   :  { %1559 = vmatpush.bf16.msra.mxu2 %v3185_v57  ;;  %1578 = vmatpush.bf16.msra.mxu3 %v3249_v63  ;;  %v3368_v57 = vld [vmem:[%s6074_s2 + $0x140] sm:$0xf]  ;;  %v3837_v63 = vld [vmem:[%s6074_s2 + $0x1c4] sm:$0xf0] }
 0x1e7   :  { %v3369_v6 = vor.u32 %v3821_v55, %v3368_v57  ;;  %v3346_v57 = vld [vmem:[%s6074_s2 + $0x118] sm:$0xf0] }
 0x1e8   :  { %1886 = vmatpush.bf16.msra.mxu1 %v3437_v11  ;;  %v3349_v58 = vor.u32 %v3814_v54, %v3346_v57  ;;  %v3638_v54 = vld [vmem:[%s6074_s2 + $0x2f8] sm:$0xf0] }
 0x1e9   :  { %1867 = vmatpush.bf16.msra.mxu0 %v3373_v10 }
 0x1ea   :  { %1560 = vmatpush.bf16.msra.mxu2 %v3177_v8  ;;  %1579 = vmatpush.bf16.msra.mxu3 %v3241_v9  ;;  %v3433_v8 = vor.u32 %v3837_v63, %v3432_v46  ;;  %v3410_v63 = vld [vmem:[%s6074_s2 + $0x198] sm:$0xf0] }
 0x1ec   :  { %1887 = vmatpush.bf16.msra.mxu1 %v3429_v22 }
 0x1ed   :  { %1868 = vmatpush.bf16.msra.mxu0 %v3365_v61  ;;  %v3402_v61 = vld [vmem:[%s6074_s2 + $0x188] sm:$0xf0] }
 0x1ee   :  { %1826 = vmatpush.bf16.msrb.mxu2 %v3393_v59  ;;  %1845 = vmatpush.bf16.msrb.mxu3 %v3457_v17  ;;  %v3425_v59 = vor.u32 %v3835_v13, %v3424_v45  ;;  %v3352_v17 = vld [vmem:[%s6074_s2 + $0x120] sm:$0xf] }
 0x1f0   :  { %1888 = vmatpush.bf16.msra.mxu1 %v3421_v53 }
 0x1f1   :  { %1869 = vmatpush.bf16.msra.mxu0 %v3357_v34 }
 0x1f2   :  { %1827 = vmatpush.bf16.msrb.mxu2 %v3385_v25  ;;  %1846 = vmatpush.bf16.msrb.mxu3 %v3449_v26  ;;  %v3417_v26 = vor.u32 %v3833_v24, %v3416_v16 }
 0x1f5   :  { %1870 = vmatpush.bf16.msra.mxu0 %v3349_v58 }
 0x1f6   :  { %1828 = vmatpush.bf16.msrb.mxu2 %v3377_v42  ;;  %1847 = vmatpush.bf16.msrb.mxu3 %v3441_v52  ;;  %v3831_v52 = vld [vmem:[%s6074_s2 + $0x194] sm:$0xf0] }
 0x1f7   :  { %v3409_v47 = vor.u32 %v3831_v52, %v3408_v49  ;;  %v3874_v52 = vld [vmem:[%s6074_s2 + $0x2f4] sm:$0xf] }
 0x1fa   :  { %1829 = vmatpush.bf16.msrb.mxu2 %v3369_v6  ;;  %1848 = vmatpush.bf16.msrb.mxu3 %v3433_v8  ;;  %v3400_v6 = vld [vmem:[%s6074_s2 + $0x180] sm:$0xf]  ;;  %v3829_v8 = vld [vmem:[%s6074_s2 + $0x184] sm:$0xf0] }
 0x1fe   :  { %1830 = vmatpush.bf16.msrb.mxu2 %v3361_v14  ;;  %1849 = vmatpush.bf16.msrb.mxu3 %v3425_v59  ;;  %v3828_v59 = vld [vmem:[%s6074_s2 + $0x184] sm:$0xf] }
 0x202   :  { %1850 = vmatpush.bf16.msrb.mxu3 %v3417_v26 }
 0x206   :  { %1851 = vmatpush.bf16.msrb.mxu3 %v3409_v47 }
 0x250   :  { %v1247_v4 = vpop.f32.mrf.mxu2  ;;  %v1267_v5 = vpop.f32.mrf.mxu3 }
 0x251   :  { %v5255_v56 = vperm.slane %v1247_v4, 0  ;;  %v5257_v9 = vperm.slane %v1267_v5, 0  ;;  %v3813_v5 = vld [vmem:[%s6074_s2 + $0x104] sm:$0xf0] }
 0x252   :  { %v3337_v48 = vor.u32 %v3813_v5, %v3336_v3  ;;  %v3630_v5 = vld [vmem:[%s6074_s2 + $0x2e8] sm:$0xf0] }
 0x253   :  { %v1315_v18 = vmul.f32 %v5255_v56, %v4837_v50  ;;  %v1317_v19 = vmul.f32 %v5255_v56, %v4833_v7  ;;  %v3353_v7 = vor.u32 %v3817_v23, %v3352_v17  ;;  %v1316_v30 = vmul.f32 %v5257_v9, %v4922_v29 }
 0x254   :  { %v1318_v33 = vmul.f32 %v5257_v9, %v4920_v27  ;;  %v3344_v27 = vld [vmem:[%s6074_s2 + $0x110] sm:$0xf]  ;;  %v1319_v45 = vmul.f32 %v5255_v56, %v4839_v51  ;;  %v1321_v14 = vmul.f32 %v5255_v56, %v4850_v62  ;;  %v3413_v51 = vor.u32 %v3830_v60, %v3410_v63 }
 0x255   :  { %1831 = vmatpush.bf16.msrb.mxu2 %v3353_v7  ;;  %v3345_v4 = vor.u32 %v3815_v40, %v3344_v27  ;;  %v3401_v62 = vor.u32 %v3829_v8, %v3400_v6  ;;  %v1320_v56 = vmul.f32 %v5257_v9, %v4924_v31  ;;  %v3858_v8 = vld [vmem:[%s6074_s2 + $0x274] sm:$0xf] }
 0x256   :  { %1889 = vmatpush.bf16.msra.mxu1 %v3413_v51  ;;  %v3856_v51 = vld [vmem:[%s6074_s2 + $0x264] sm:$0xf] }
 0x257   :  { %1852 = vmatpush.bf16.msrb.mxu3 %v3401_v62  ;;  %v1630_v62 = vld [vmem:[%s6077_s3 + $0x8] sm:$0xff] }
 0x258   :  { %v1290_v20 = vpop.f32.mrf.mxu2  ;;  %v1310_v21 = vpop.f32.mrf.mxu3 }
 0x259   :  { %v5299_v50 = vperm.slane %v1290_v20, 0  ;;  %v5301_v25 = vperm.slane %v1310_v21, 0  ;;  %1832 = vmatpush.bf16.msrb.mxu2 %v3345_v4  ;;  %v3405_v20 = vor.u32 %v3828_v59, %v3402_v61  ;;  %v3872_v4 = vld [vmem:[%s6074_s2 + $0x2e4] sm:$0xf] }
 0x25b   :  { %v1325_v35 = vadd.f32 %v5299_v50, %v1315_v18  ;;  %v1327_v36 = vadd.f32 %v5299_v50, %v1317_v19  ;;  %v1326_v39 = vadd.f32 %v5301_v25, %v1316_v30  ;;  %v1328_v29 = vadd.f32 %v5301_v25, %v1318_v33  ;;  %1890 = vmatpush.bf16.msra.mxu1 %v3405_v20  ;;  %v3854_v20 = vld [vmem:[%s6074_s2 + $0x254] sm:$0xf] }
 0x25c   :  { %v1329_v44 = vadd.f32 %v5299_v50, %v1319_v45  ;;  %v1331_v17 = vadd.f32 %v5299_v50, %v1321_v14  ;;  %v1322_v18 = vmul.f32 %v5257_v9, %v4935_v41  ;;  %v3341_v19 = vor.u32 %v3812_v12, %v3338_v15  ;;  %v3870_v45 = vld [vmem:[%s6074_s2 + $0x2d4] sm:$0xf]  ;;  %v3622_v14 = vld [vmem:[%s6074_s2 + $0x2d8] sm:$0xf0] }
 0x25d   :  { %vm1333_vm5 = vcmp.ge.f32.partialorder %v1325_v35, 0.0  ;;  %vm1335_vm6 = vcmp.ge.f32.partialorder %v1327_v36, 0.0  ;;  %v1341_v42 = vmul.f32 0.2, %v1325_v35  ;;  %v1343_v43 = vmul.f32 0.2, %v1327_v36  ;;  %1833 = vmatpush.bf16.msrb.mxu2 %v3337_v48 }
 0x25e   :  { %vm1334_vm7 = vcmp.ge.f32.partialorder %v1326_v39, 0.0  ;;  %vm1336_vm8 = vcmp.ge.f32.partialorder %v1328_v29, 0.0  ;;  %v1342_v1 = vmul.f32 0.2, %v1326_v39  ;;  %v1344_v2 = vmul.f32 0.2, %v1328_v29  ;;  %1871 = vmatpush.bf16.msra.mxu0 %v3341_v19 }
 0x25f   :  { %v1349_v55 = vsel %vm1333_vm5, %v1325_v35, %v1341_v42  ;;  %v1351_v46 = vsel %vm1335_vm6, %v1327_v36, %v1343_v43  ;;  %v1330_v21 = vadd.f32 %v5301_v25, %v1320_v56  ;;  %v1332_v31 = vadd.f32 %v5301_v25, %v1322_v18  ;;  %v3566_v48 = vld [vmem:[%s6074_s2 + $0x268] sm:$0xf0] }
 0x260   :  { %v5347_v0 = vpack.c.bf16 %v1351_v46, %v1349_v55  ;;  %v1350_v10 = vsel %vm1334_vm7, %v1326_v39, %v1342_v1  ;;  %v1352_v11 = vsel %vm1336_vm8, %v1328_v29, %v1344_v2  ;;  %v1345_v22 = vmul.f32 0.2, %v1329_v44  ;;  %v1629_v1 = vld [vmem:[%s6077_s3] sm:$0xff]  ;;  %v3614_v18 = vld [vmem:[%s6074_s2 + $0x2c8] sm:$0xf0] }
 0x261   :  { %v5370_v13 = vpack.c.bf16 %v1352_v11, %v1350_v10  ;;  %v1347_v23 = vmul.f32 0.2, %v1331_v17  ;;  %vm1337_vm9 = vcmp.ge.f32.partialorder %v1329_v44, 0.0  ;;  %vm1339_vm10 = vcmp.ge.f32.partialorder %v1331_v17, 0.0  ;;  %v3574_v10 = vld [vmem:[%s6074_s2 + $0x278] sm:$0xf0] }
 0x262   :  { %1561 = vmatmul.bf16.vlgmr.msra.gmra.mxu2 %v5347_v0  ;;  %1599 = vmatmul.bf16.vlgmr.msrb.gmra.mxu0 %v5347_v0  ;;  %v1346_v16 = vmul.f32 0.2, %v1330_v21  ;;  %v1348_v24 = vmul.f32 0.2, %v1332_v31  ;;  %v1353_v50 = vsel %vm1337_vm9, %v1329_v44, %v1345_v22  ;;  %vm1338_vm11 = vcmp.ge.f32.partialorder %v1330_v21, 0.0 }
 0x263   :  { %1580 = vmatmul.bf16.vlgmr.msra.gmra.mxu3 %v5370_v13  ;;  %1618 = vmatmul.bf16.vlgmr.msrb.gmra.mxu1 %v5370_v13  ;;  %v1355_v41 = vsel %vm1339_vm10, %v1331_v17, %v1347_v23  ;;  %vm1340_vm12 = vcmp.ge.f32.partialorder %v1332_v31, 0.0  ;;  %v3641_v2 = vor.u32 %v3874_v52, %v3638_v54  ;;  %v3633_v12 = vor.u32 %v3872_v4, %v3630_v5  ;;  %v3868_v17 = vld [vmem:[%s6074_s2 + $0x2c4] sm:$0xf]  ;;  %v3866_v23 = vld [vmem:[%s6074_s2 + $0x2b4] sm:$0xf]  ;;  %v1632_v52 = vld [vmem:[%s6077_s3 + $0x18] sm:$0xff] }
 0x264   :  { %v5391_v9 = vpack.c.bf16 %v1355_v41, %v1353_v50  ;;  %v1354_v7 = vsel %vm1338_vm11, %v1330_v21, %v1346_v16  ;;  %v1356_v26 = vsel %vm1340_vm12, %v1332_v31, %v1348_v24  ;;  %v3577_v59 = vor.u32 %v3858_v8, %v3574_v10  ;;  %v3558_v21 = vld [vmem:[%s6074_s2 + $0x258] sm:$0xf0]  ;;  %v3846_v5 = vld [vmem:[%s6074_s2 + $0x214] sm:$0xf] }
 0x265   :  { %v5395_v25 = vpack.c.bf16 %v1356_v26, %v1354_v7  ;;  %v3625_v56 = vor.u32 %v3870_v45, %v3622_v14  ;;  %v3569_v19 = vor.u32 %v3856_v51, %v3566_v48  ;;  %v3617_v22 = vor.u32 %v3868_v17, %v3614_v18  ;;  %v3606_v16 = vld [vmem:[%s6074_s2 + $0x2b8] sm:$0xf0]  ;;  %v3852_v7 = vld [vmem:[%s6074_s2 + $0x244] sm:$0xf]  ;;  %v3550_v26 = vld [vmem:[%s6074_s2 + $0x248] sm:$0xf0] }
 0x266   :  { %v3561_v50 = vor.u32 %v3854_v20, %v3558_v21  ;;  %v3844_v51 = vld [vmem:[%s6074_s2 + $0x204] sm:$0xf]  ;;  %v3518_v48 = vld [vmem:[%s6074_s2 + $0x208] sm:$0xf0]  ;;  %v3572_v18 = vld [vmem:[%s6074_s2 + $0x270] sm:$0xf] }
 0x267   :  { %v3521_v17 = vor.u32 %v3844_v51, %v3518_v48 }
 0x272   :  { %1566 = vmatmul.bf16.gmra.mxu2 %v5391_v9  ;;  %1604 = vmatmul.bf16.gmra.mxu0 %v5391_v9 }
 0x273   :  { %1585 = vmatmul.bf16.gmra.mxu3 %v5395_v25  ;;  %1623 = vmatmul.bf16.gmra.mxu1 %v5395_v25 }
 0x282   :  { %1834 = vmatmul.bf16.vlgmr.msrb.gmra.mxu2 %v5347_v0  ;;  %1872 = vmatmul.bf16.vlgmr.msra.gmra.mxu0 %v5347_v0 }
 0x283   :  { %1853 = vmatmul.bf16.vlgmr.msrb.gmra.mxu3 %v5370_v13  ;;  %1891 = vmatmul.bf16.vlgmr.msra.gmra.mxu1 %v5370_v13 }
 0x292   :  { %1839 = vmatmul.bf16.gmra.mxu2 %v5391_v9  ;;  %1877 = vmatmul.bf16.gmra.mxu0 %v5391_v9 }
 0x293   :  { %1858 = vmatmul.bf16.gmra.mxu3 %v5395_v25  ;;  %1896 = vmatmul.bf16.gmra.mxu1 %v5395_v25 }
 0x2df   :  { %v1600_v28 = vpop.f32.mrf.mxu0 }
 0x2e0   :  { %v1619_v32 = vpop.f32.mrf.mxu1 }
 0x2e1   :  { %v1620_v60 = vadd.f32 %v1619_v32, %v1600_v28  ;;  %v1631_v28 = vld [vmem:[%s6077_s3 + $0x10] sm:$0xff]  ;;  %v3609_v32 = vor.u32 %v3866_v23, %v3606_v16 }
 0x2e5   :  { %v1562_v30 = vpop.f32.mrf.mxu2 }
 0x2e6   :  { %v1581_v34 = vpop.f32.mrf.mxu3 }
 0x2e7   :  { %v1602_v33 = vpop.f32.mrf.mxu0  ;;  %v1582_v58 = vadd.f32 %v1581_v34, %v1562_v30  ;;  %v3598_v34 = vld [vmem:[%s6074_s2 + $0x2a8] sm:$0xf0] }
 0x2e8   :  { %v1621_v35 = vpop.f32.mrf.mxu1 }
 0x2e9   :  { %v1622_v57 = vadd.f32 %v1621_v35, %v1602_v33  ;;  %v3864_v33 = vld [vmem:[%s6074_s2 + $0x2a4] sm:$0xf]  ;;  %v3553_v35 = vor.u32 %v3852_v7, %v3550_v26  ;;  %v5603_v7 = vld [vmem:[%s6072_s4 + $0x78] sm:$0xff] }
 0x2ed   :  { %v1564_v36 = vpop.f32.mrf.mxu2 }
 0x2ee   :  { %v1583_v38 = vpop.f32.mrf.mxu3 }
 0x2ef   :  { %v1605_v37 = vpop.f32.mrf.mxu0  ;;  %v1584_v11 = vadd.f32 %v1583_v38, %v1564_v36  ;;  %v3850_v36 = vld [vmem:[%s6074_s2 + $0x234] sm:$0xf] }
 0x2f0   :  { %v1624_v39 = vpop.f32.mrf.mxu1 }
 0x2f1   :  { %v1625_v53 = vadd.f32 %v1624_v39, %v1605_v37  ;;  %v3542_v37 = vld [vmem:[%s6074_s2 + $0x238] sm:$0xf0]  ;;  %v3601_v39 = vor.u32 %v3864_v33, %v3598_v34  ;;  %v3556_v33 = vld [vmem:[%s6074_s2 + $0x250] sm:$0xf]  ;;  %v3855_v34 = vld [vmem:[%s6074_s2 + $0x254] sm:$0xf0] }
 0x2f5   :  { %v1567_v29 = vpop.f32.mrf.mxu2 }
 0x2f6   :  { %v1586_v40 = vpop.f32.mrf.mxu3 }
 0x2f7   :  { %v1607_v27 = vpop.f32.mrf.mxu0  ;;  %v1587_v6 = vadd.f32 %v1586_v40, %v1567_v29  ;;  %v3862_v29 = vld [vmem:[%s6074_s2 + $0x294] sm:$0xf]  ;;  %v3545_v40 = vor.u32 %v3850_v36, %v3542_v37 }
 0x2f8   :  { %v1626_v42 = vpop.f32.mrf.mxu1  ;;  %v5630_v36 = vld [vmem:[%s6072_s4 + $0x70] sm:$0xff] }
 0x2f9   :  { %v1627_v43 = vadd.f32 %v1626_v42, %v1607_v27  ;;  %v3590_v27 = vld [vmem:[%s6074_s2 + $0x298] sm:$0xf0] }
 0x2fa   :  { %v3593_v54 = vor.u32 %v3862_v29, %v3590_v27  ;;  %v3604_v29 = vld [vmem:[%s6074_s2 + $0x2b0] sm:$0xf]  ;;  %v3867_v27 = vld [vmem:[%s6074_s2 + $0x2b4] sm:$0xf0] }
 0x2fb   :  { %2031 = vmatpush.msrb.mxu1 %v1627_v43 }
 0x2fd   :  { %v1569_v49 = vpop.f32.mrf.mxu2  ;;  %2032 = vmatpush.msrb.mxu1 %v1625_v53  ;;  %v3848_v53 = vld [vmem:[%s6074_s2 + $0x224] sm:$0xf] }
 0x2fe   :  { %v1588_v46 = vpop.f32.mrf.mxu3 }
 0x2ff   :  { %v5413_v55 = vpop.f32.mrf.mxu0  ;;  %v1589_v63 = vadd.f32 %v1588_v46, %v1569_v49  ;;  %2033 = vmatpush.msrb.mxu1 %v1622_v57  ;;  %v3534_v49 = vld [vmem:[%s6074_s2 + $0x228] sm:$0xf0]  ;;  %v3860_v46 = vld [vmem:[%s6074_s2 + $0x284] sm:$0xf] }
 0x300   :  { %v5418_v3 = vpop.f32.mrf.mxu1 }
 0x301   :  { %2002 = vmatpush.msrb.mxu0 %v1589_v63  ;;  %2034 = vmatpush.msrb.mxu1 %v1620_v60  ;;  %v3582_v60 = vld [vmem:[%s6074_s2 + $0x288] sm:$0xf0] }
 0x302   :  { %3478 = vmatmul.msk.f32.vlgmr.msrb.gmra.mxu1 %vm1907_vm13, %v1629_v1  ;;  %v3585_v4 = vor.u32 %v3860_v46, %v3582_v60  ;;  %v3596_v46 = vld [vmem:[%s6074_s2 + $0x2a0] sm:$0xf]  ;;  %v3865_v60 = vld [vmem:[%s6074_s2 + $0x2a4] sm:$0xf0] }
 0x303   :  { %2003 = vmatpush.msrb.mxu0 %v1587_v6  ;;  %2298 = vmatpush.bf16.msra.mxu1 %v3641_v2  ;;  %v3526_v6 = vld [vmem:[%s6074_s2 + $0x218] sm:$0xf0] }
 0x304   :  { %v3529_v14 = vor.u32 %v3846_v5, %v3526_v6  ;;  %v3597_v5 = vor.u32 %v3865_v60, %v3596_v46  ;;  %v5702_v6 = vld [vmem:[%s6072_s4 + $0xc0] sm:$0xff] }
 0x305   :  { %v5433_v47 = vpop.f32.mrf.mxu2  ;;  %2004 = vmatpush.msrb.mxu0 %v1584_v11  ;;  %v3636_v11 = vld [vmem:[%s6074_s2 + $0x2f0] sm:$0xf] }
 0x306   :  { %v5443_v61 = vpop.f32.mrf.mxu3 }
 0x307   :  { %v5441_v15 = vpop.f32.mrf.mxu0  ;;  %2005 = vmatpush.msrb.mxu0 %v1582_v58  ;;  %2299 = vmatpush.bf16.msra.mxu1 %v3633_v12  ;;  %v3875_v12 = vld [vmem:[%s6074_s2 + $0x2f4] sm:$0xf0]  ;;  %v1893_v58 = vadd.f32 %v5418_v3, %v5413_v55  ;;  %v1855_v23 = vadd.f32 %v5443_v61, %v5433_v47  ;;  %v5594_v47 = vld [vmem:[%s6072_s4 + $0xe8] sm:$0xff] }
 0x308   :  { %v1894_v44 = vpop.f32.mrf.mxu1  ;;  %3474 = vmatmul.msk.f32.vlgmr.msrb.gmra.mxu0 %vm1907_vm13, %v1629_v1  ;;  %v3537_v1 = vor.u32 %v3848_v53, %v3534_v49  ;;  %v5552_v55 = vld [vmem:[%s6072_s4 + $0xf8] sm:$0xff]  ;;  %v3463_v61 = vld [vmem:[%s6077_s3 + $0x28] sm:$0xff]  ;;  %v5660_v53 = vld [vmem:[%s6072_s4 + $0xd0] sm:$0xff] }
 0x309   :  { %2279 = vmatpush.bf16.msra.mxu0 %v3577_v59  ;;  %v1895_v10 = vadd.f32 %v1894_v44, %v5441_v15  ;;  %v3462_v15 = vld [vmem:[%s6077_s3 + $0x20] sm:$0xff]  ;;  %v3873_v44 = vld [vmem:[%s6074_s2 + $0x2e4] sm:$0xf0]  ;;  %v3464_v49 = vld [vmem:[%s6077_s3 + $0x30] sm:$0xff] }
 0x30a   :  { %3479 = vmatmul.msk.f32.gmra.mxu1 %vm1907_vm13, %v1630_v62 }
 0x30b   :  { %2300 = vmatpush.bf16.msra.mxu1 %v3625_v56  ;;  %v3628_v56 = vld [vmem:[%s6074_s2 + $0x2e0] sm:$0xf] }
 0x30c   :  { %v3629_v21 = vor.u32 %v3873_v44, %v3628_v56  ;;  %v3524_v56 = vld [vmem:[%s6074_s2 + $0x210] sm:$0xf]  ;;  %v3847_v44 = vld [vmem:[%s6074_s2 + $0x214] sm:$0xf0] }
 0x30d   :  { %v5468_v31 = vpop.f32.mrf.mxu2  ;;  %2280 = vmatpush.bf16.msra.mxu0 %v3569_v19  ;;  %v3859_v19 = vld [vmem:[%s6074_s2 + $0x274] sm:$0xf0] }
 0x30e   :  { %v5476_v41 = vpop.f32.mrf.mxu3  ;;  %v3573_v16 = vor.u32 %v3859_v19, %v3572_v18  ;;  %v5762_v18 = vld [vmem:[%s6072_s4 + $0x40] sm:$0xff] }
 0x30f   :  { %v1878_v24 = vpop.f32.mrf.mxu0  ;;  %2301 = vmatpush.bf16.msra.mxu1 %v3617_v22  ;;  %v1857_v20 = vadd.f32 %v5476_v41, %v5468_v31  ;;  %v5574_v22 = vld [vmem:[%s6072_s4 + $0xf0] sm:$0xff]  ;;  %v3857_v41 = vld [vmem:[%s6074_s2 + $0x264] sm:$0xf0] }
 0x310   :  { %v1897_v30 = vpop.f32.mrf.mxu1  ;;  %3475 = vmatmul.msk.f32.gmra.mxu0 %vm1907_vm13, %v1630_v62  ;;  %v3637_v62 = vor.u32 %v3875_v12, %v3636_v11  ;;  %v3620_v31 = vld [vmem:[%s6074_s2 + $0x2d0] sm:$0xf]  ;;  %v3863_v11 = vld [vmem:[%s6074_s2 + $0x294] sm:$0xf0] }
 0x311   :  { %2281 = vmatpush.bf16.msra.mxu0 %v3561_v50  ;;  %v1898_v2 = vadd.f32 %v1897_v30, %v1878_v24  ;;  %v3871_v24 = vld [vmem:[%s6074_s2 + $0x2d4] sm:$0xf0]  ;;  %v3564_v50 = vld [vmem:[%s6074_s2 + $0x260] sm:$0xf]  ;;  %v3869_v30 = vld [vmem:[%s6074_s2 + $0x2c4] sm:$0xf0] }
 0x312   :  { %3480 = vmatmul.msk.f32.gmra.mxu1 %vm1907_vm13, %v1631_v28  ;;  %v3621_v26 = vor.u32 %v3871_v24, %v3620_v31  ;;  %v5714_v12 = vld [vmem:[%s6072_s4 + $0x50] sm:$0xff]  ;;  %v3845_v31 = vld [vmem:[%s6074_s2 + $0x204] sm:$0xf0]  ;;  %v5786_v24 = vld [vmem:[%s6072_s4 + $0xa0] sm:$0xff] }
 0x313   :  { %2302 = vmatpush.bf16.msra.mxu1 %v3609_v32  ;;  %v3612_v32 = vld [vmem:[%s6074_s2 + $0x2c0] sm:$0xf] }
 0x314   :  { %v3613_v37 = vor.u32 %v3869_v30, %v3612_v32  ;;  %v5818_v32 = vld [vmem:[%s6072_s4 + $0x20] sm:$0xff]  ;;  %v5824_v30 = vld [vmem:[%s6072_s4 + $0x88] sm:$0xff] }
 0x315   :  { %v1840_v38 = vpop.f32.mrf.mxu2  ;;  %2282 = vmatpush.bf16.msra.mxu0 %v3553_v35  ;;  %v5624_v35 = vld [vmem:[%s6072_s4 + $0xe0] sm:$0xff] }
 0x316   :  { %v1859_v42 = vpop.f32.mrf.mxu3 }
 0x317   :  { %v1880_v43 = vpop.f32.mrf.mxu0  ;;  %2303 = vmatpush.bf16.msra.mxu1 %v3601_v39  ;;  %v1860_v3 = vadd.f32 %v1859_v42, %v1840_v38  ;;  %v5636_v38 = vld [vmem:[%s6072_s4 + $0xd8] sm:$0xff]  ;;  %v3557_v39 = vor.u32 %v3855_v34, %v3556_v33  ;;  %v3548_v42 = vld [vmem:[%s6074_s2 + $0x240] sm:$0xf]  ;;  %v5843_v34 = vld [vmem:[%s6072_s4 + $0x10] sm:$0xff] }
 0x318   :  { %v1899_v57 = vpop.f32.mrf.mxu1  ;;  %3476 = vmatmul.msk.f32.gmra.mxu0 %vm1907_vm13, %v1631_v28  ;;  %v3565_v28 = vor.u32 %v3857_v41, %v3564_v50  ;;  %v5792_v50 = vld [vmem:[%s6072_s4 + $0x30] sm:$0xff]  ;;  %v5836_v33 = vld [vmem:[%s6072_s4 + $0x80] sm:$0xff] }
 0x319   :  { %v1900_v63 = vadd.f32 %v1899_v57, %v1880_v43  ;;  %2283 = vmatpush.bf16.msra.mxu0 %v3545_v40  ;;  %v5648_v40 = vld [vmem:[%s6072_s4 + $0x68] sm:$0xff] }
 0x31a   :  { %3481 = vmatmul.msk.f32.gmra.mxu1 %vm1907_vm13, %v1632_v52  ;;  %v3853_v43 = vld [vmem:[%s6074_s2 + $0x244] sm:$0xf0] }
 0x31b   :  { %1961 = vmatpush.msra.mxu3 %v1900_v63  ;;  %2304 = vmatpush.bf16.msra.mxu1 %v3593_v54  ;;  %v3605_v54 = vor.u32 %v3867_v27, %v3604_v29  ;;  %v3549_v57 = vor.u32 %v3853_v43, %v3548_v42  ;;  %v5682_v63 = vld [vmem:[%s6072_s4 + $0xc8] sm:$0xff]  ;;  %v5867_v29 = vld [vmem:[%s6072_s4] sm:$0xff]  ;;  %v5873_v27 = vld [vmem:[%s6073_s5 + $0x10] sm:$0xff] }
 0x31c   :  { %v5879_v42 = vld [vmem:[%s6073_s5] sm:$0xff] }
 0x31d   :  { %v1842_v8 = vpop.f32.mrf.mxu2  ;;  %1962 = vmatpush.msra.mxu3 %v1898_v2  ;;  %2284 = vmatpush.bf16.msra.mxu0 %v3537_v1  ;;  %v3540_v1 = vld [vmem:[%s6074_s2 + $0x230] sm:$0xf]  ;;  %v3851_v2 = vld [vmem:[%s6074_s2 + $0x234] sm:$0xf0] }
 0x31e   :  { %v1861_v45 = vpop.f32.mrf.mxu3 }
 0x31f   :  { %v1862_v59 = vadd.f32 %v1861_v45, %v1842_v8  ;;  %1963 = vmatpush.msra.mxu3 %v1895_v10  ;;  %2305 = vmatpush.bf16.msra.mxu1 %v3585_v4  ;;  %v5695_v4 = vld [vmem:[%s6072_s4 + $0x58] sm:$0xff]  ;;  %v3541_v8 = vor.u32 %v3851_v2, %v3540_v1  ;;  %v3588_v10 = vld [vmem:[%s6074_s2 + $0x290] sm:$0xf]  ;;  %v3532_v45 = vld [vmem:[%s6074_s2 + $0x220] sm:$0xf] }
 0x320   :  { %3477 = vmatmul.msk.f32.gmra.mxu0 %vm1907_vm13, %v1632_v52  ;;  %v5669_v52 = vld [vmem:[%s6072_s4 + $0x60] sm:$0xff]  ;;  %v3589_v51 = vor.u32 %v3863_v11, %v3588_v10 }
 0x321   :  { %1932 = vmatpush.msra.mxu2 %v1862_v59  ;;  %1964 = vmatpush.msra.mxu3 %v1893_v58  ;;  %v5726_v58 = vld [vmem:[%s6072_s4 + $0xb8] sm:$0xff] }
 0x322   :  { %2285 = vmatpush.bf16.msra.mxu0 %v3529_v14  ;;  %3470 = vmatmul.msk.f32.vlgmr.msra.gmra.mxu3 %vm1907_vm13, %v3462_v15  ;;  %v3849_v14 = vld [vmem:[%s6074_s2 + $0x224] sm:$0xf0]  ;;  %v3465_v59 = vld [vmem:[%s6077_s3 + $0x38] sm:$0xff] }
 0x323   :  { %2466 = vmatpush.msrb.mxu1 %v5552_v55  ;;  %1933 = vmatpush.msra.mxu2 %v1860_v3  ;;  %v3533_v48 = vor.u32 %v3849_v14, %v3532_v45  ;;  %v3861_v3 = vld [vmem:[%s6074_s2 + $0x284] sm:$0xf0] }
 0x324   :  { %2306 = vmatmul.bf16.vlgmr.msra.gmra.mxu1 %v5370_v13  ;;  %2260 = vmatpush.bf16.msrb.mxu3 %v3637_v62  ;;  %v3580_v62 = vld [vmem:[%s6074_s2 + $0x280] sm:$0xf] }
 0x325   :  { %2467 = vmatpush.msrb.mxu1 %v5574_v22  ;;  %1934 = vmatpush.msra.mxu2 %v1857_v20  ;;  %v3581_v19 = vor.u32 %v3861_v3, %v3580_v62  ;;  %v5768_v20 = vld [vmem:[%s6072_s4 + $0xa8] sm:$0xff] }
 0x326   :  { %2286 = vmatpush.bf16.msra.mxu0 %v3521_v17  ;;  %v5756_v17 = vld [vmem:[%s6072_s4 + $0xb0] sm:$0xff] }
 0x327   :  { %2468 = vmatpush.msrb.mxu1 %v5594_v47  ;;  %1935 = vmatpush.msra.mxu2 %v1855_v23  ;;  %v5774_v23 = vld [vmem:[%s6072_s4 + $0x38] sm:$0xff] }
 0x328   :  { %2261 = vmatpush.bf16.msrb.mxu3 %v3629_v21  ;;  %3466 = vmatmul.msk.f32.vlgmr.msra.gmra.mxu2 %vm1907_vm13, %v3462_v15  ;;  %v5735_v15 = vld [vmem:[%s6072_s4 + $0x48] sm:$0xff]  ;;  %v3525_v21 = vor.u32 %v3847_v44, %v3524_v56 }
 0x329   :  { %2287 = vmatmul.bf16.vlgmr.msra.gmra.mxu0 %v5347_v0  ;;  %2241 = vmatpush.bf16.msrb.mxu2 %v3573_v16  ;;  %v3516_v16 = vld [vmem:[%s6074_s2 + $0x200] sm:$0xf] }
 0x32a   :  { %2446 = vmatpush.msrb.mxu0 %v5603_v7  ;;  %3471 = vmatmul.msk.f32.gmra.mxu3 %vm1907_vm13, %v3463_v61  ;;  %v3517_v41 = vor.u32 %v3845_v31, %v3516_v16 }
 0x32b   :  { %2469 = vmatpush.msrb.mxu1 %v5624_v35 }
 0x32c   :  { %2447 = vmatpush.msrb.mxu0 %v5630_v36  ;;  %2262 = vmatpush.bf16.msrb.mxu3 %v3621_v26  ;;  %v5805_v26 = vld [vmem:[%s6072_s4 + $0x28] sm:$0xff] }
 0x32d   :  { %2470 = vmatpush.msrb.mxu1 %v5636_v38  ;;  %2242 = vmatpush.bf16.msrb.mxu2 %v3565_v28  ;;  %v5812_v28 = vld [vmem:[%s6072_s4 + $0x90] sm:$0xff] }
 0x32e   :  { %2448 = vmatpush.msrb.mxu0 %v5648_v40 }
 0x32f   :  { %2471 = vmatpush.msrb.mxu1 %v5660_v53 }
 0x330   :  { %2449 = vmatpush.msrb.mxu0 %v5669_v52  ;;  %2263 = vmatpush.bf16.msrb.mxu3 %v3613_v37  ;;  %v5849_v37 = vld [vmem:[%s6073_s5 + $0x18] sm:$0xff] }
 0x331   :  { %3467 = vmatmul.msk.f32.gmra.mxu2 %vm1907_vm13, %v3463_v61  ;;  %2472 = vmatpush.msrb.mxu1 %v5682_v63  ;;  %v5799_v61 = vld [vmem:[%s6072_s4 + $0x98] sm:$0xff] }
 0x332   :  { %2243 = vmatpush.bf16.msrb.mxu2 %v3557_v39  ;;  %3472 = vmatmul.msk.f32.gmra.mxu3 %vm1907_vm13, %v3464_v49  ;;  %v5855_v39 = vld [vmem:[%s6072_s4 + $0x8] sm:$0xff] }
 0x333   :  { %2450 = vmatpush.msrb.mxu0 %v5695_v4  ;;  %2473 = vmatpush.msrb.mxu1 %v5702_v6 }
 0x334   :  { %2311 = vmatmul.bf16.gmra.mxu1 %v5395_v25  ;;  %2264 = vmatpush.bf16.msrb.mxu3 %v3605_v54 }
 0x335   :  { %2451 = vmatpush.msrb.mxu0 %v5714_v12  ;;  %2474 = vmatpush.msrb.mxu1 %v5726_v58 }
 0x336   :  { %2244 = vmatpush.bf16.msrb.mxu2 %v3549_v57 }
 0x337   :  { %2452 = vmatpush.msrb.mxu0 %v5735_v15  ;;  %2475 = vmatpush.msrb.mxu1 %v5756_v17 }
 0x338   :  { %2265 = vmatpush.bf16.msrb.mxu3 %v3597_v5 }
 0x339   :  { %3468 = vmatmul.msk.f32.gmra.mxu2 %vm1907_vm13, %v3464_v49  ;;  %2292 = vmatmul.bf16.gmra.mxu0 %v5391_v9 }
 0x33a   :  { %2245 = vmatpush.bf16.msrb.mxu2 %v3541_v8  ;;  %3473 = vmatmul.msk.f32.gmra.mxu3 %vm1907_vm13, %v3465_v59 }
 0x33b   :  { %2453 = vmatpush.msrb.mxu0 %v5762_v18  ;;  %2476 = vmatpush.msrb.mxu1 %v5768_v20 }
 0x33c   :  { %2266 = vmatpush.bf16.msrb.mxu3 %v3589_v51 }
 0x33d   :  { %2454 = vmatpush.msrb.mxu0 %v5774_v23  ;;  %2477 = vmatpush.msrb.mxu1 %v5786_v24 }
 0x33e   :  { %2246 = vmatpush.bf16.msrb.mxu2 %v3533_v48 }
 0x33f   :  { %2455 = vmatpush.msrb.mxu0 %v5792_v50  ;;  %2478 = vmatpush.msrb.mxu1 %v5799_v61 }
 0x340   :  { %2267 = vmatpush.bf16.msrb.mxu3 %v3581_v19 }
 0x341   :  { %3469 = vmatmul.msk.f32.gmra.mxu2 %vm1907_vm13, %v3465_v59  ;;  %2456 = vmatpush.msrb.mxu0 %v5805_v26 }
 0x342   :  { %2247 = vmatpush.bf16.msrb.mxu2 %v3525_v21  ;;  %2479 = vmatpush.msrb.mxu1 %v5812_v28 }
 0x343   :  { %2268 = vmatmul.bf16.vlgmr.msrb.gmra.mxu3 %v5370_v13  ;;  %2457 = vmatpush.msrb.mxu0 %v5818_v32  ;;  %v5830_v13 = vld [vmem:[%s6072_s4 + $0x18] sm:$0xff] }
 0x344   :  { %2480 = vmatpush.msrb.mxu1 %v5824_v30 }
 0x345   :  { %2458 = vmatpush.msrb.mxu0 %v5830_v13 }
 0x346   :  { %2248 = vmatpush.bf16.msrb.mxu2 %v3517_v41  ;;  %2481 = vmatpush.msrb.mxu1 %v5836_v33 }
 0x347   :  { %2459 = vmatpush.msrb.mxu0 %v5843_v34 }
 0x348   :  { %2581 = vmatpush.msra.mxu1 %v5849_v37 }
 0x349   :  { %2249 = vmatmul.bf16.vlgmr.msrb.gmra.mxu2 %v5347_v0  ;;  %2460 = vmatpush.msrb.mxu0 %v5855_v39  ;;  %v5861_v0 = vld [vmem:[%s6073_s5 + $0x8] sm:$0xff] }
 0x34a   :  { %2582 = vmatpush.msra.mxu1 %v5861_v0 }
 0x34b   :  { %2461 = vmatpush.msrb.mxu0 %v5867_v29 }
 0x34d   :  { %2561 = vmatpush.msra.mxu0 %v5873_v27 }
 0x34f   :  { %2562 = vmatpush.msra.mxu0 %v5879_v42 }
 0x353   :  { %2273 = vmatmul.bf16.gmra.mxu3 %v5395_v25 }
 0x359   :  { %2254 = vmatmul.bf16.gmra.mxu2 %v5391_v9 }
 0x37f   :  { %v2036_v43 = vpop.f32.mrf.mxu1 }
 0x385   :  { %v2007_v49 = vpop.f32.mrf.mxu0 }
 0x387   :  { %v2039_v54 = vpop.f32.mrf.mxu1 }
 0x38d   :  { %v2010_v57 = vpop.f32.mrf.mxu0 }
 0x38f   :  { %v2042_v46 = vpop.f32.mrf.mxu1 }
 0x395   :  { %v2013_v60 = vpop.f32.mrf.mxu0 }
 0x397   :  { %v2045_v1 = vpop.f32.mrf.mxu1 }
 0x39d   :  { %v2016_v2 = vpop.f32.mrf.mxu0 }
 0x3a1   :  { %v2307_v5 = vpop.f32.mrf.mxu1 }
 0x3a5   :  { %v1966_v8 = vpop.f32.mrf.mxu3 }
 0x3a6   :  { %v5884_v10 = vadd.f32 %v2036_v43, %v1966_v8  ;;  %v2288_v11 = vpop.f32.mrf.mxu0 }
 0x3a9   :  { %v2309_v45 = vpop.f32.mrf.mxu1 }
 0x3ab   :  { %v1937_v14 = vpop.f32.mrf.mxu2 }
 0x3ac   :  { %v5886_v59 = vadd.f32 %v2007_v49, %v1937_v14 }
 0x3ad   :  { %v1969_v25 = vpop.f32.mrf.mxu3 }
 0x3ae   :  { %v5888_v51 = vadd.f32 %v2039_v54, %v1969_v25  ;;  %v2290_v9 = vpop.f32.mrf.mxu0 }
 0x3af   :  { %v2310_v14 = vadd.f32 %v2309_v45, %v2290_v9 }
 0x3b1   :  { %v2312_v62 = vpop.f32.mrf.mxu1 }
 0x3b4   :  { %v1940_v48 = vpop.f32.mrf.mxu2 }
 0x3b5   :  { %v5890_v3 = vadd.f32 %v2010_v57, %v1940_v48  ;;  %v1972_v56 = vpop.f32.mrf.mxu3  ;;  %v2308_v48 = vadd.f32 %v2307_v5, %v2288_v11 }
 0x3b6   :  { %v5892_v44 = vadd.f32 %v2042_v46, %v1972_v56  ;;  %v2293_v19 = vpop.f32.mrf.mxu0  ;;  %v3642_v46 = vld [vmem:[%s6077_s3 + $0x40] sm:$0xff] }
 0x3b7   :  { %v2313_v54 = vadd.f32 %v2312_v62, %v2293_v19 }
 0x3b9   :  { %v2314_v41 = vpop.f32.mrf.mxu1 }
 0x3bc   :  { %v1943_v21 = vpop.f32.mrf.mxu2 }
 0x3bd   :  { %v5894_v16 = vadd.f32 %v2013_v60, %v1943_v21  ;;  %v1975_v31 = vpop.f32.mrf.mxu3 }
 0x3be   :  { %v5896_v43 = vadd.f32 %v2045_v1, %v1975_v31  ;;  %v2295_v49 = vpop.f32.mrf.mxu0 }
 0x3bf   :  { %v2315_v8 = vadd.f32 %v2314_v41, %v2295_v49 }
 0x3c1   :  { %2375 = vmatpush.msra.mxu3 %v2315_v8 }
 0x3c3   :  { %2376 = vmatpush.msra.mxu3 %v2313_v54 }
 0x3c4   :  { %v1946_v25 = vpop.f32.mrf.mxu2 }
 0x3c5   :  { %v5898_v57 = vadd.f32 %v2016_v2, %v1946_v25  ;;  %2377 = vmatpush.msra.mxu3 %v2310_v14  ;;  %v3643_v2 = vld [vmem:[%s6077_s3 + $0x48] sm:$0xff] }
 0x3c6   :  { %v2269_v60 = vpop.f32.mrf.mxu3 }
 0x3c7   :  { %2378 = vmatpush.msra.mxu3 %v2308_v48 }
 0x3c8   :  { %3650 = vmatmul.msk.f32.vlgmr.msra.gmra.mxu3 %vm1907_vm13, %v3642_v46 }
 0x3c9   :  { %2507 = vmatpush.msrb.mxu3 %v5552_v55  ;;  %v3644_v55 = vld [vmem:[%s6077_s3 + $0x50] sm:$0xff] }
 0x3cb   :  { %2508 = vmatpush.msrb.mxu3 %v5574_v22 }
 0x3cc   :  { %v2250_v1 = vpop.f32.mrf.mxu2 }
 0x3cd   :  { %2509 = vmatpush.msrb.mxu3 %v5594_v47 }
 0x3ce   :  { %v2271_v5 = vpop.f32.mrf.mxu3 }
 0x3cf   :  { %2510 = vmatpush.msrb.mxu3 %v5624_v35  ;;  %v3645_v35 = vld [vmem:[%s6077_s3 + $0x58] sm:$0xff] }
 0x3d0   :  { %3651 = vmatmul.msk.f32.gmra.mxu3 %vm1907_vm13, %v3643_v2 }
 0x3d1   :  { %2511 = vmatpush.msrb.mxu3 %v5636_v38 }
 0x3d3   :  { %2512 = vmatpush.msrb.mxu3 %v5660_v53 }
 0x3d4   :  { %v2252_v11 = vpop.f32.mrf.mxu2 }
 0x3d5   :  { %2513 = vmatpush.msrb.mxu3 %v5682_v63 }
 0x3d6   :  { %v2274_v22 = vpop.f32.mrf.mxu3 }
 0x3d7   :  { %2514 = vmatpush.msrb.mxu3 %v5702_v6 }
 0x3d8   :  { %3652 = vmatmul.msk.f32.gmra.mxu3 %vm1907_vm13, %v3644_v55 }
 0x3d9   :  { %2515 = vmatpush.msrb.mxu3 %v5726_v58  ;;  %v2272_v58 = vadd.f32 %v2271_v5, %v2252_v11 }
 0x3db   :  { %2516 = vmatpush.msrb.mxu3 %v5756_v17  ;;  %v2270_v17 = vadd.f32 %v2269_v60, %v2250_v1 }
 0x3dc   :  { %v2255_v47 = vpop.f32.mrf.mxu2 }
 0x3dd   :  { %2517 = vmatpush.msrb.mxu3 %v5768_v20  ;;  %v2275_v6 = vadd.f32 %v2274_v22, %v2255_v47 }
 0x3de   :  { %v2276_v38 = vpop.f32.mrf.mxu3 }
 0x3df   :  { %2518 = vmatpush.msrb.mxu3 %v5786_v24 }
 0x3e0   :  { %3653 = vmatmul.msk.f32.gmra.mxu3 %vm1907_vm13, %v3645_v35 }
 0x3e1   :  { %2519 = vmatpush.msrb.mxu3 %v5799_v61 }
 0x3e3   :  { %2520 = vmatpush.msrb.mxu3 %v5812_v28 }
 0x3e4   :  { %v2257_v53 = vpop.f32.mrf.mxu2 }
 0x3e5   :  { %v2277_v63 = vadd.f32 %v2276_v38, %v2257_v53  ;;  %2521 = vmatpush.msrb.mxu3 %v5824_v30 }
 0x3e7   :  { %2346 = vmatpush.msra.mxu2 %v2277_v63  ;;  %2522 = vmatpush.msrb.mxu3 %v5836_v33 }
 0x3e9   :  { %2347 = vmatpush.msra.mxu2 %v2275_v6 }
 0x3eb   :  { %2348 = vmatpush.msra.mxu2 %v2272_v58 }
 0x3ed   :  { %2349 = vmatpush.msra.mxu2 %v2270_v17 }
 0x3ee   :  { %3646 = vmatmul.msk.f32.vlgmr.msra.gmra.mxu2 %vm1907_vm13, %v3642_v46 }
 0x3ef   :  { %2487 = vmatpush.msrb.mxu2 %v5603_v7 }
 0x3f1   :  { %2488 = vmatpush.msrb.mxu2 %v5630_v36 }
 0x3f3   :  { %2489 = vmatpush.msrb.mxu2 %v5648_v40 }
 0x3f5   :  { %2490 = vmatpush.msrb.mxu2 %v5669_v52 }
 0x3f6   :  { %3647 = vmatmul.msk.f32.gmra.mxu2 %vm1907_vm13, %v3643_v2 }
 0x3f7   :  { %2491 = vmatpush.msrb.mxu2 %v5695_v4 }
 0x3f9   :  { %2492 = vmatpush.msrb.mxu2 %v5714_v12 }
 0x3fb   :  { %2493 = vmatpush.msrb.mxu2 %v5735_v15 }
 0x3fd   :  { %2494 = vmatpush.msrb.mxu2 %v5762_v18 }
 0x3fe   :  { %3648 = vmatmul.msk.f32.gmra.mxu2 %vm1907_vm13, %v3644_v55 }
 0x3ff   :  { %2495 = vmatpush.msrb.mxu2 %v5774_v23 }
 0x401   :  { %2496 = vmatpush.msrb.mxu2 %v5792_v50 }
 0x403   :  { %2497 = vmatpush.msrb.mxu2 %v5805_v26 }
 0x405   :  { %2498 = vmatpush.msrb.mxu2 %v5818_v32 }
 0x406   :  { %3649 = vmatmul.msk.f32.gmra.mxu2 %vm1907_vm13, %v3645_v35 }
 0x407   :  { %2499 = vmatpush.msrb.mxu2 %v5830_v13 }
 0x409   :  { %2500 = vmatpush.msrb.mxu2 %v5843_v34 }
 0x40b   :  { %2501 = vmatpush.msrb.mxu2 %v5855_v39 }
 0x40d   :  { %2502 = vmatpush.msrb.mxu2 %v5867_v29 }
 0x44b   :  { %v2380_v7 = vpop.f32.mrf.mxu3 }
 0x44c   :  { %v5956_v4 = vadd.f32 %v2380_v7, %v5884_v10 }
 0x44e   :  { %v2421_v18 = vmul.f32 %v5956_v4, %v5956_v4 }
 0x453   :  { %v2383_v36 = vpop.f32.mrf.mxu3 }
 0x454   :  { %v5953_v52 = vadd.f32 %v2383_v36, %v5888_v51 }
 0x456   :  { %v2423_v15 = vmul.f32 %v5953_v52, %v5953_v52  ;;  %v2411_v20 = vadd.f32 %v5953_v52, %v5956_v4 }
 0x458   :  { %v2437_v50 = vadd.f32 %v2423_v15, %v2421_v18 }
 0x45b   :  { %v2386_v40 = vpop.f32.mrf.mxu3 }
 0x45c   :  { %v5959_v12 = vadd.f32 %v2386_v40, %v5892_v44 }
 0x45e   :  { %v2425_v23 = vmul.f32 %v5959_v12, %v5959_v12  ;;  %v2412_v61 = vadd.f32 %v2411_v20, %v5959_v12 }
 0x460   :  { %v2438_v28 = vadd.f32 %v2437_v50, %v2425_v23 }
 0x463   :  { %v2389_v24 = vpop.f32.mrf.mxu3 }
 0x464   :  { %v5971_v26 = vadd.f32 %v2389_v24, %v5896_v43 }
 0x466   :  { %v2413_v32 = vadd.f32 %v2412_v61, %v5971_v26  ;;  %v2427_v30 = vmul.f32 %v5971_v26, %v5971_v26 }
 0x468   :  { %v2414_v13 = vrot.slane %v2413_v32, 4  ;;  %v2439_v33 = vadd.f32 %v2438_v28, %v2427_v30 }
 0x46a   :  { %v2415_v34 = vadd.f32 %v2414_v13, %v2413_v32  ;;  %v2440_v39 = vrot.slane %v2439_v33, 4 }
 0x46c   :  { %v2416_v29 = vrot.slane %v2415_v34, 2  ;;  %v2441_v10 = vadd.f32 %v2440_v39, %v2439_v33 }
 0x46e   :  { %v2417_v45 = vadd.f32 %v2416_v29, %v2415_v34  ;;  %v2442_v51 = vrot.slane %v2441_v10, 2  ;;  %v2401_v29 = vld [vmem:[%s6079_s9] sm:$0x1] }
 0x470   :  { %v2418_v9 = vrot.slane %v2417_v45, 1  ;;  %v2443_v62 = vadd.f32 %v2442_v51, %v2441_v10 }
 0x471   :  { %v2351_v56 = vpop.f32.mrf.mxu2 }
 0x472   :  { %v2419_v44 = vadd.f32 %v2418_v9, %v2417_v45  ;;  %v2444_v19 = vrot.slane %v2443_v62, 1  ;;  %v5982_v49 = vadd.f32 %v2351_v56, %v5886_v59 }
 0x474   :  { %2482 = vmatmul.f32.vlgmr.msrb.gmra.mxu1 %v2419_v44  ;;  %v2445_v21 = vadd.f32 %v2444_v19, %v2443_v62 }
 0x475   :  { %2624 = vmatpush.msrb.mxu1 %v5849_v37  ;;  %v2420_v37 = vmul.f32 %v5982_v49, %v5982_v49 }
 0x476   :  { %2523 = vmatmul.f32.vlgmr.msrb.gmra.mxu3 %v2445_v21 }
 0x477   :  { %2625 = vmatpush.msrb.mxu1 %v5861_v0 }
 0x479   :  { %v2354_v31 = vpop.f32.mrf.mxu2 }
 0x47a   :  { %v5979_v43 = vadd.f32 %v2354_v31, %v5890_v3 }
 0x47c   :  { %v2422_v54 = vmul.f32 %v5979_v43, %v5979_v43  ;;  %v2402_v0 = vadd.f32 %v5979_v43, %v5982_v49 }
 0x47e   :  { %v2428_v25 = vadd.f32 %v2422_v54, %v2420_v37 }
 0x481   :  { %v2357_v41 = vpop.f32.mrf.mxu2 }
 0x482   :  { %v5985_v8 = vadd.f32 %v2357_v41, %v5894_v16 }
 0x484   :  { %v2424_v14 = vmul.f32 %v5985_v8, %v5985_v8  ;;  %v2403_v59 = vadd.f32 %v2402_v0, %v5985_v8 }
 0x486   :  { %v2429_v16 = vadd.f32 %v2428_v25, %v2424_v14 }
 0x489   :  { %v2360_v3 = vpop.f32.mrf.mxu2 }
 0x48a   :  { %v5997_v48 = vadd.f32 %v2360_v3, %v5898_v57 }
 0x48c   :  { %v2404_v46 = vadd.f32 %v2403_v59, %v5997_v48  ;;  %v2426_v60 = vmul.f32 %v5997_v48, %v5997_v48 }
 0x48e   :  { %v2405_v1 = vrot.slane %v2404_v46, 4  ;;  %v2430_v2 = vadd.f32 %v2429_v16, %v2426_v60  ;;  %v2651_v60 = vld [vmem:[%s6080_s10 + $0x8] sm:$0xff] }
 0x490   :  { %v2406_v5 = vadd.f32 %v2405_v1, %v2404_v46  ;;  %v2431_v11 = vrot.slane %v2430_v2, 4 }
 0x492   :  { %v2407_v55 = vrot.slane %v2406_v5, 2  ;;  %v2432_v22 = vadd.f32 %v2431_v11, %v2430_v2 }
 0x494   :  { %v2408_v47 = vadd.f32 %v2407_v55, %v2406_v5  ;;  %v2433_v35 = vrot.slane %v2432_v22, 2  ;;  %v2653_v55 = vld [vmem:[%s6080_s10 + $0x18] sm:$0xff] }
 0x496   :  { %v2409_v38 = vrot.slane %v2408_v47, 1  ;;  %v2434_v53 = vadd.f32 %v2433_v35, %v2432_v22  ;;  %v2657_v35 = vld [vmem:[%s6080_s10 + $0x38] sm:$0xff] }
 0x498   :  { %v2410_v63 = vadd.f32 %v2409_v38, %v2408_v47  ;;  %v2435_v6 = vrot.slane %v2434_v53, 1 }
 0x49a   :  { %2462 = vmatmul.f32.vlgmr.msrb.gmra.mxu0 %v2410_v63  ;;  %v2436_v57 = vadd.f32 %v2435_v6, %v2434_v53 }
 0x49b   :  { %2604 = vmatpush.msrb.mxu0 %v5873_v27 }
 0x49c   :  { %2503 = vmatmul.f32.vlgmr.msrb.gmra.mxu2 %v2436_v57 }
 0x49d   :  { %2605 = vmatpush.msrb.mxu0 %v5879_v42  ;;  %v2400_v42 = vld [vmem:[%s6078_s8] sm:$0x1] }
 0x4f1   :  { %v2483_v17 = vpop.f32.mrf.mxu1 }
 0x4f9   :  { %v2524_v40 = vpop.f32.mrf.mxu3 }
 0x517   :  { %v2463_v58 = vpop.f32.mrf.mxu0 }
 0x518   :  { %v2484_v7 = vadd.f32 %v2483_v17, %v2463_v58 }
 0x51a   :  { %v2486_v36 = vmul.f32 0.001953125, %v2484_v7 }
 0x51c   :  { %v2528_v20 = vmul.f32 %v2486_v36, %v2486_v36 }
 0x51f   :  { %v2504_v15 = vpop.f32.mrf.mxu2 }
 0x520   :  { %v2525_v18 = vadd.f32 %v2524_v40, %v2504_v15 }
 0x522   :  { %v2527_v23 = vmul.f32 0.001953125, %v2525_v18 }
 0x524   :  { %v2529_v24 = vsub.f32 %v2527_v23, %v2528_v20 }
 0x526   :  { %v2530_v50 = vadd.f32 1e-05, %v2529_v24 }
 0x528   :  { %3878 = vrsqrt.f32 %v2530_v50  ;;  %vm2537_vm15 = vweird.f32 %v2530_v50 }
 0x52e   :  { %v3879_v61 = vpop.eup %3878 }
 0x52f   :  { %v2532_v28 = vmul.f32 %v3879_v61, %v2530_v50  ;;  %vm2538_vm14 = vweird.f32 %v3879_v61 }
 0x530   :  { %vm2539_vm0 = vmor %vm2537_vm15, %vm2538_vm14 }
 0x531   :  { %v2533_v32 = vmul.f32 %v3879_v61, %v2532_v28 }
 0x533   :  { %v2534_v30 = vmul.f32 0.5, %v2533_v32 }
 0x535   :  { %v2535_v27 = vsub.f32 1.5, %v2534_v30 }
 0x537   :  { %v2536_v13 = vmul.f32 %v3879_v61, %v2535_v27 }
 0x539   :  { %v2540_v33 = vsel %vm2539_vm0, %v3879_v61, %v2536_v13 }
 0x53a   :  { %v2541_v34 = vmul.f32 %v2540_v33, %v2400_v42 }
 0x53c   :  { %3654 = vmatmul.msk.f32.vlgmr.msra.gmra.mxu0 %vm1226_vm4, %v2541_v34  ;;  %3655 = vmatmul.msk.f32.vlgmr.msra.gmra.mxu1 %vm1226_vm4, %v2541_v34  ;;  %v2542_v39 = vmul.f32 %v2541_v34, %v2486_v36 }
 0x53e   :  { %v2543_v10 = vsub.f32 %v2401_v29, %v2542_v39 }
 0x544   :  { %3656 = vmatmul.msk.f32.vlgmr.msrb.gmra.mxu0 %vm1226_vm4, %v2543_v10  ;;  %3657 = vmatmul.msk.f32.vlgmr.msrb.gmra.mxu1 %vm1226_vm4, %v2543_v10 }
 0x5b9   :  { %v2564_v45 = vpop.f32.mrf.mxu0  ;;  %v2584_v51 = vpop.f32.mrf.mxu1 }
 0x5ba   :  { %v2630_v9 = vperm.slane %v2564_v45, 0  ;;  %v2631_v62 = vperm.slane %v2584_v51, 0 }
 0x5bc   :  { %v2632_v56 = vmul.f32 %v2630_v9, %v5982_v49  ;;  %v2634_v44 = vmul.f32 %v2630_v9, %v5979_v43  ;;  %v2636_v31 = vmul.f32 %v2630_v9, %v5985_v8  ;;  %v2638_v41 = vmul.f32 %v2630_v9, %v5997_v48  ;;  %v2650_v49 = vld [vmem:[%s6080_s10] sm:$0xff]  ;;  %v2652_v43 = vld [vmem:[%s6080_s10 + $0x10] sm:$0xff] }
 0x5bd   :  { %v2633_v0 = vmul.f32 %v2631_v62, %v5956_v4  ;;  %v2635_v14 = vmul.f32 %v2631_v62, %v5953_v52  ;;  %v2637_v3 = vmul.f32 %v2631_v62, %v5959_v12  ;;  %v2654_v8 = vld [vmem:[%s6080_s10 + $0x20] sm:$0xff]  ;;  %v2656_v52 = vld [vmem:[%s6080_s10 + $0x30] sm:$0xff]  ;;  %v2639_v12 = vmul.f32 %v2631_v62, %v5971_v26  ;;  %v2655_v26 = vld [vmem:[%s6080_s10 + $0x28] sm:$0xff] }
 0x5c1   :  { %v2607_v19 = vpop.f32.mrf.mxu0  ;;  %v2627_v21 = vpop.f32.mrf.mxu1 }
 0x5c2   :  { %v2640_v54 = vperm.slane %v2607_v19, 0  ;;  %v2641_v37 = vperm.slane %v2627_v21, 0 }
 0x5c4   :  { %v2642_v25 = vadd.f32 %v2640_v54, %v2632_v56  ;;  %v2644_v59 = vadd.f32 %v2640_v54, %v2634_v44  ;;  %v2646_v48 = vadd.f32 %v2640_v54, %v2636_v31  ;;  %v2648_v4 = vadd.f32 %v2640_v54, %v2638_v41 }
 0x5c5   :  { %v2643_v16 = vadd.f32 %v2641_v37, %v2633_v0  ;;  %v2645_v46 = vadd.f32 %v2641_v37, %v2635_v14  ;;  %v2647_v11 = vadd.f32 %v2641_v37, %v2637_v3  ;;  %v2649_v47 = vadd.f32 %v2641_v37, %v2639_v12 }
 0x5c6   :  { %v2658_v1 = vadd.f32 %v2650_v49, %v2642_v25  ;;  %v2660_v2 = vadd.f32 %v2652_v43, %v2644_v59  ;;  %v2662_v5 = vadd.f32 %v2654_v8, %v2646_v48  ;;  %v2664_v22 = vadd.f32 %v2656_v52, %v2648_v4 }
 0x5c7   :  { %v2659_v38 = vadd.f32 %v2651_v60, %v2643_v16  ;;  %v2661_v53 = vadd.f32 %v2653_v55, %v2645_v46  ;;  %v2663_v63 = vadd.f32 %v2655_v26, %v2647_v11  ;;  %v2665_v6 = vadd.f32 %v2657_v35, %v2649_v47 }
 0x5c8   :  { %2666 = vst [vmem:[%s6081_s11] sm:$0xff] %v2658_v1 }
 0x5c9   :  { %2668 = vst [vmem:[%s6081_s11 + $0x10] sm:$0xff] %v2660_v2 }
 0x5ca   :  { %2670 = vst [vmem:[%s6081_s11 + $0x20] sm:$0xff] %v2662_v5 }
 0x5cb   :  { %2672 = vst [vmem:[%s6081_s11 + $0x30] sm:$0xff] %v2664_v22 }
 0x5cc   :  { %2667 = vst [vmem:[%s6081_s11 + $0x8] sm:$0xff] %v2659_v38 }
 0x5cd   :  { %2669 = vst [vmem:[%s6081_s11 + $0x18] sm:$0xff] %v2661_v53 }
 0x5ce   :  { %2671 = vst [vmem:[%s6081_s11 + $0x28] sm:$0xff] %v2663_v63 }
 0x5cf   :  { %2673 = vst [vmem:[%s6081_s11 + $0x38] sm:$0xff] %v2665_v6 }

</bundles_post_ra>
